<compile_context>
chip_gen: v7x
topology: tpu7x:2x2x1
jax: 0.10.0
libtpu: 0.0.40
codegen_flags: <defaults>
</compile_context>

<pallas_src>
import jax
import jax.numpy as jnp
from jax import lax
from jax.experimental import pallas as pl
from jax.experimental.pallas import tpu as pltpu

# ---- Loihi neuron / simulation parameters (oxford.yaml) --------------------
IDECAY   = 1024          # current decay (out of 4096)
VDECAY   = 128           # voltage decay (out of 4096)
VTH_MANT = 80            # threshold mantissa
WGT_EXP  = 0             # weight exponent
TS       = 1             # simulation time step

THETA     = float(VTH_MANT * (1 << 6))       # vThMant * 2^6
WSCALE    = float(1 << (6 + WGT_EXP))        # weight scaling into the neuron (2^6)
I_ALPHA   = (4096.0 - IDECAY) / 4096.0       # current decay factor
V_ALPHA   = (4096.0 - VDECAY) / 4096.0       # voltage decay factor
SPIKE_AMP = 1.0 / TS                         # spike amplitude

# TODO(synk): Loihi HW uses fixed-point state with shift/floor rounding and a
# refractory counter (refDelay); here the CUBA dynamics are float32 with immediate
# reset-to-zero on spike.


def _round_up(v, m):
    return -(-v // m) * m


def _cuba_chunk_scan(z_ref, s_ref, cur_ref, volt_ref, last_ref, n_steps, bt):
    """CUBA Loihi dynamics over one time chunk, batch-vectorized over (bt, n) tiles.

    z_ref:   (n_steps*bt, n) f32 synaptic drive; rows [t*bt,(t+1)*bt) = local step t.
    s_ref:   delayed-spike destination for this chunk: row block 0 receives the
             previous chunk's last spike (from last_ref); spike(local t) is written
             to row block t+1 (delayShift by 1).
    cur_ref / volt_ref / last_ref: persistent cross-chunk carries.
    """
    # Delayed spike row-block 0 of this chunk = last spike of the previous chunk.
    s_ref[pl.ds(0, bt), :] = last_ref[...]

    def body(t, carry):
        cur, volt = carry
        z = z_ref[pl.ds(pl.multiple_of(t * bt, bt), bt), :]          # (bt, n)
        cur = cur * I_ALPHA + z            # WSCALE is pre-folded into the weights
        volt = volt * V_ALPHA + cur
        fired = volt >= THETA
        s_ref[pl.ds(pl.multiple_of((t + 1) * bt, bt), bt), :] = (
            jnp.where(fired, SPIKE_AMP, 0.0).astype(s_ref.dtype))
        return cur, jnp.where(fired, 0.0, volt)                      # reset on spike

    cur, volt = lax.fori_loop(0, n_steps - 1, body,
                              (cur_ref[...], volt_ref[...]),
                              unroll=min(8, max(1, n_steps - 1)))

    # Last step of the chunk: its spike feeds the NEXT chunk, so it goes to the
    # cross-chunk carry instead of this chunk's delayed-spike buffer.
    z = z_ref[pl.ds((n_steps - 1) * bt, bt), :]
    cur = cur * I_ALPHA + z
    volt = volt * V_ALPHA + cur
    fired = volt >= THETA
    last_ref[...] = jnp.where(fired, SPIKE_AMP, 0.0).astype(last_ref.dtype)
    cur_ref[...] = cur
    volt_ref[...] = jnp.where(fired, 0.0, volt)


def snn_forward(x, w1, w2, *, bt=16, tc=None):
    """x: (B, T, Nin) float32 spikes; w1: (Nhid, Nin); w2: (Nout, Nhid)."""
    B, T, Nin = x.shape
    Nhid = w1.shape[0]
    Nout = w2.shape[0]

    if tc is None:
        # ~4 chunks for small demo sequences, 128-step chunks at real Oxford sizes.
        tc = min(128, max(2, -(-T // 4)))

    # Lane-dense channel padding (real model: 200 -> 256), batch-tile and time-chunk
    # padding.  Padded time steps only produce outputs that are sliced away (causal).
    nin_p  = _round_up(Nin, 128)
    nhid_p = _round_up(Nhid, 128)
    nout_p = _round_up(Nout, 128)
    b_p    = _round_up(B, bt)
    nb     = b_p // bt
    t_p    = _round_up(T, tc)
    nc     = t_p // tc
    rows   = tc * bt                       # rows per (batch-tile, time-chunk) slab

    # Spikes are exactly {0, 1/TS} (exact in bf16) and Loihi weights are coarse, so
    # bf16 MXU operands with f32 accumulation keep the dynamics essentially unchanged.
    xb = jnp.zeros((b_p, t_p, nin_p), jnp.bfloat16).at[:B, :T, :Nin].set(
        x.astype(jnp.bfloat16))
    # (b_p, t_p, nin_p) -> (nb, t_p*bt, nin_p): row t*bt + b inside each batch tile.
    xk = xb.reshape(nb, bt, t_p, nin_p).transpose(0, 2, 1, 3).reshape(nb, t_p * bt, nin_p)

    # Fold WSCALE (power of two -> exact) into the transposed, padded bf16 weights.
    w1k = jnp.zeros((nin_p, nhid_p), jnp.bfloat16).at[:Nin, :Nhid].set(
        (WSCALE * jnp.asarray(w1, jnp.float32).T).astype(jnp.bfloat16))
    w2k = jnp.zeros((nhid_p, nout_p), jnp.bfloat16).at[:Nhid, :Nout].set(
        (WSCALE * jnp.asarray(w2, jnp.float32).T).astype(jnp.bfloat16))

    def kernel(x_ref, w1_ref, w2_ref, out_ref,
               z1_ref, s1_ref, z2_ref,
               cur1_ref, volt1_ref, cur2_ref, volt2_ref,
               s1_last_ref, s2_last_ref):
        c = pl.program_id(1)

        # New batch tile: reset all cross-chunk carries.
        @pl.when(c == 0)
        def _():
            cur1_ref[...] = jnp.zeros_like(cur1_ref)
            volt1_ref[...] = jnp.zeros_like(volt1_ref)
            cur2_ref[...] = jnp.zeros_like(cur2_ref)
            volt2_ref[...] = jnp.zeros_like(volt2_ref)
            s1_last_ref[...] = jnp.zeros_like(s1_last_ref)
            s2_last_ref[...] = jnp.zeros_like(s2_last_ref)

        # fc1 over this time chunk: one MXU matmul (bf16 in, f32 acc).
        z1_ref[...] = jnp.dot(x_ref[...], w1_ref[...],
                              preferred_element_type=jnp.float32)

        # Layer-1 CUBA scan; delayed spikes land in the bf16 s1 buffer.
        _cuba_chunk_scan(z1_ref, s1_ref, cur1_ref, volt1_ref, s1_last_ref, tc, bt)

        # fc2 on the delayed layer-1 spikes (already bf16, no cast pass needed).
        z2_ref[...] = jnp.dot(s1_ref[...], w2_ref[...],
                              preferred_element_type=jnp.float32)

        # Layer-2 CUBA scan writes the delayed spikes straight into the bf16 output
        # block (no s2 scratch, no final VMEM-to-VMEM copy).
        _cuba_chunk_scan(z2_ref, out_ref, cur2_ref, volt2_ref, s2_last_ref, tc, bt)

    # VMEM budget: double-buffered input/output blocks and weights + per-chunk scratch
    # + carries, with headroom for Mosaic internal scratch.
    io_bytes = 2 * (rows * nin_p * 2) + 2 * (rows * nout_p * 2)
    w_bytes = 2 * (nin_p * nhid_p * 2 + nhid_p * nout_p * 2)
    scr_bytes = (rows * nhid_p * 4 + rows * nhid_p * 2 + rows * nout_p * 4
                 + 2 * bt * nhid_p * 4 + 2 * bt * nout_p * 4
                 + bt * nhid_p * 2 + bt * nout_p * 2)
    vmem_limit = min(max(int(1.5 * (io_bytes + w_bytes + scr_bytes)) + (4 << 20),
                         16 << 20),
                     110 << 20)

    out = pl.pallas_call(
        kernel,
        out_shape=jax.ShapeDtypeStruct((nb, t_p * bt, nout_p), jnp.bfloat16),
        grid_spec=pltpu.PrefetchScalarGridSpec(
            num_scalar_prefetch=0,
            grid=(nb, nc),                       # batch tiles (parallel) x time chunks
            in_specs=[
                pl.BlockSpec((None, rows, nin_p), lambda j, c: (j, c, 0)),
                pl.BlockSpec((nin_p, nhid_p), lambda j, c: (0, 0)),
                pl.BlockSpec((nhid_p, nout_p), lambda j, c: (0, 0)),
            ],
            out_specs=pl.BlockSpec((None, rows, nout_p), lambda j, c: (j, c, 0)),
            scratch_shapes=[
                pltpu.VMEM((rows, nhid_p), jnp.float32),    # z1 = fc1 drive (chunk)
                pltpu.VMEM((rows, nhid_p), jnp.bfloat16),   # s1 = delayed L1 spikes
                pltpu.VMEM((rows, nout_p), jnp.float32),    # z2 = fc2 drive (chunk)
                pltpu.VMEM((bt, nhid_p), jnp.float32),      # cur1  carry
                pltpu.VMEM((bt, nhid_p), jnp.float32),      # volt1 carry
                pltpu.VMEM((bt, nout_p), jnp.float32),      # cur2  carry
                pltpu.VMEM((bt, nout_p), jnp.float32),      # volt2 carry
                pltpu.VMEM((bt, nhid_p), jnp.bfloat16),     # last L1 spike carry
                pltpu.VMEM((bt, nout_p), jnp.bfloat16),     # last L2 spike carry
            ],
        ),
        compiler_params=pltpu.CompilerParams(
            dimension_semantics=("parallel", "arbitrary"),
            vmem_limit_bytes=vmem_limit),
    )(xk, w1k, w2k)

    # (nb, t_p*bt, nout_p) -> (B, T, Nout), back to f32 outside the kernel.
    out = out.reshape(nb, t_p, bt, nout_p).transpose(0, 2, 1, 3).reshape(b_p, t_p, nout_p)
    return out[:B, :T, :Nout].astype(jnp.float32)


if __name__ == "__main__":
    # Small shapes consistent with the module (yaml: Nin=200, Nhid=256, Nout=200,
    # T=1999) scaled down for the demo.
    B, T, Nin, Nhid, Nout = 2, 32, 16, 32, 16

    key = jax.random.PRNGKey(0)
    kx, k1, k2 = jax.random.split(key, 3)

    # Input spike raster in {0, 1}
    x = (jax.random.uniform(kx, (B, T, Nin)) < 0.3).astype(jnp.float32)

    # Deterministic synthetic dense weights (slayer.dense == conv with 1x1x1 kernel)
    w1 = 4.0 * jax.random.normal(k1, (Nhid, Nin), dtype=jnp.float32)
    w2 = 4.0 * jax.random.normal(k2, (Nout, Nhid), dtype=jnp.float32)

    fwd = jax.jit(snn_forward)
    out = jax.block_until_ready(fwd(x, w1, w2))

    assert out.shape == (B, T, Nout)
    assert out.dtype == jnp.float32
    assert bool(jnp.all(jnp.isfinite(out)))
    assert bool(jnp.all((out == 0.0) | (out == SPIKE_AMP)))   # outputs are spikes
    assert bool(jnp.all(out[:, 0, :] == 0.0))                 # delayShift(., 1)
    print("KERNEL_OK")
</pallas_src>

<mosaic_0001>
module attributes {stable_mosaic.version = 11 : i64} {
  func.func @kernel(%arg0: i32, %arg1: i32, %arg2: memref<1x128x128xbf16, #tpu.memory_space<vmem>>, %arg3: memref<128x128xbf16, #tpu.memory_space<vmem>>, %arg4: memref<128x128xbf16, #tpu.memory_space<vmem>>, %arg5: memref<1x128x128xbf16, #tpu.memory_space<vmem>>, %arg6: memref<128x128xf32, #tpu.memory_space<vmem>>, %arg7: memref<128x128xbf16, #tpu.memory_space<vmem>>, %arg8: memref<128x128xf32, #tpu.memory_space<vmem>>, %arg9: memref<16x128xf32, #tpu.memory_space<vmem>>, %arg10: memref<16x128xf32, #tpu.memory_space<vmem>>, %arg11: memref<16x128xf32, #tpu.memory_space<vmem>>, %arg12: memref<16x128xf32, #tpu.memory_space<vmem>>, %arg13: memref<16x128xbf16, #tpu.memory_space<vmem>>, %arg14: memref<16x128xbf16, #tpu.memory_space<vmem>>) attributes {dimension_semantics = [#tpu.dimension_semantics<parallel>, #tpu.dimension_semantics<arbitrary>], iteration_bounds = array<i64: 1, 4>, scalar_prefetch = 0 : i64, scratch_operands = 9 : i64, tpu.core_type = #tpu.core_type<tc>, window_params = [{transform_indices = @transform_0, window_bounds = array<i64: 1, 128, 128>}, {pipeline_mode = #tpu.pipeline_mode<synchronous>, transform_indices = @transform_1, window_bounds = array<i64: 128, 128>}, {pipeline_mode = #tpu.pipeline_mode<synchronous>, transform_indices = @transform_2, window_bounds = array<i64: 128, 128>}, {transform_indices = @transform_3, window_bounds = array<i64: 1, 128, 128>}]} {
    %c0_i32 = arith.constant 0 : i32
    %0 = arith.cmpi eq, %arg1, %c0_i32 : i32
    %1 = arith.extui %0 : i1 to i32
    %c0_i32_0 = arith.constant 0 : i32
    %2 = arith.cmpi ne, %1, %c0_i32_0 : i32
    scf.if %2 {
      %cst_227 = arith.constant 0.000000e+00 : f32
      %394 = vector.broadcast %cst_227 : f32 to vector<16x128xf32>
      %c0_228 = arith.constant 0 : index
      %c0_229 = arith.constant 0 : index
      %395 = vector.load %arg9[%c0_228, %c0_229] : memref<16x128xf32, #tpu.memory_space<vmem>>, vector<16x128xf32>
      tpu.vector_store %arg9[%c0_228, %c0_229], %394 {strides = array<i32>} : memref<16x128xf32, #tpu.memory_space<vmem>>, vector<16x128xf32>,
      %cst_230 = arith.constant 0.000000e+00 : f32
      %396 = vector.broadcast %cst_230 : f32 to vector<16x128xf32>
      %c0_231 = arith.constant 0 : index
      %c0_232 = arith.constant 0 : index
      %397 = vector.load %arg10[%c0_231, %c0_232] : memref<16x128xf32, #tpu.memory_space<vmem>>, vector<16x128xf32>
      tpu.vector_store %arg10[%c0_231, %c0_232], %396 {strides = array<i32>} : memref<16x128xf32, #tpu.memory_space<vmem>>, vector<16x128xf32>,
      %cst_233 = arith.constant 0.000000e+00 : f32
      %398 = vector.broadcast %cst_233 : f32 to vector<16x128xf32>
      %c0_234 = arith.constant 0 : index
      %c0_235 = arith.constant 0 : index
      %399 = vector.load %arg11[%c0_234, %c0_235] : memref<16x128xf32, #tpu.memory_space<vmem>>, vector<16x128xf32>
      tpu.vector_store %arg11[%c0_234, %c0_235], %398 {strides = array<i32>} : memref<16x128xf32, #tpu.memory_space<vmem>>, vector<16x128xf32>,
      %cst_236 = arith.constant 0.000000e+00 : f32
      %400 = vector.broadcast %cst_236 : f32 to vector<16x128xf32>
      %c0_237 = arith.constant 0 : index
      %c0_238 = arith.constant 0 : index
      %401 = vector.load %arg12[%c0_237, %c0_238] : memref<16x128xf32, #tpu.memory_space<vmem>>, vector<16x128xf32>
      tpu.vector_store %arg12[%c0_237, %c0_238], %400 {strides = array<i32>} : memref<16x128xf32, #tpu.memory_space<vmem>>, vector<16x128xf32>,
      %cst_239 = arith.constant 0.000000e+00 : bf16
      %402 = vector.broadcast %cst_239 : bf16 to vector<16x128xbf16>
      %c0_240 = arith.constant 0 : index
      %c0_241 = arith.constant 0 : index
      %403 = vector.load %arg13[%c0_240, %c0_241] : memref<16x128xbf16, #tpu.memory_space<vmem>>, vector<16x128xbf16>
      tpu.vector_store %arg13[%c0_240, %c0_241], %402 {strides = array<i32>} : memref<16x128xbf16, #tpu.memory_space<vmem>>, vector<16x128xbf16>,
      %cst_242 = arith.constant 0.000000e+00 : bf16
      %404 = vector.broadcast %cst_242 : bf16 to vector<16x128xbf16>
      %c0_243 = arith.constant 0 : index
      %c0_244 = arith.constant 0 : index
      %405 = vector.load %arg14[%c0_243, %c0_244] : memref<16x128xbf16, #tpu.memory_space<vmem>>, vector<16x128xbf16>
      tpu.vector_store %arg14[%c0_243, %c0_244], %404 {strides = array<i32>} : memref<16x128xbf16, #tpu.memory_space<vmem>>, vector<16x128xbf16>,
    } else {
    }
    %c0 = arith.constant 0 : index
    %c0_1 = arith.constant 0 : index
    %c0_2 = arith.constant 0 : index
    %3 = vector.load %arg2[%c0, %c0_1, %c0_2] : memref<1x128x128xbf16, #tpu.memory_space<vmem>>, vector<1x128x128xbf16>
    %4 = vector.shape_cast %3 : vector<1x128x128xbf16> to vector<128x128xbf16>
    %c0_3 = arith.constant 0 : index
    %c0_4 = arith.constant 0 : index
    %5 = vector.load %arg3[%c0_3, %c0_4] : memref<128x128xbf16, #tpu.memory_space<vmem>>, vector<128x128xbf16>
    %cst = arith.constant dense<0.000000e+00> : vector<128x128xf32>
    %6 = tpu.matmul %4, %5, %cst {dimension_numbers = #tpu.dot_dimension_numbers<[1], [0], [0], [1], [0, 0, 1, 1], [], []>} : vector<128x128xbf16>, vector<128x128xbf16>, vector<128x128xf32> -> vector<128x128xf32>
    %c0_5 = arith.constant 0 : index
    %c0_6 = arith.constant 0 : index
    %7 = vector.load %arg6[%c0_5, %c0_6] : memref<128x128xf32, #tpu.memory_space<vmem>>, vector<128x128xf32>
    tpu.vector_store %arg6[%c0_5, %c0_6], %6 {strides = array<i32>} : memref<128x128xf32, #tpu.memory_space<vmem>>, vector<128x128xf32>,
    %c0_7 = arith.constant 0 : index
    %c0_8 = arith.constant 0 : index
    %8 = vector.load %arg13[%c0_7, %c0_8] : memref<16x128xbf16, #tpu.memory_space<vmem>>, vector<16x128xbf16>
    %c0_9 = arith.constant 0 : index
    %c0_10 = arith.constant 0 : index
    %9 = vector.load %arg7[%c0_9, %c0_10] : memref<128x128xbf16, #tpu.memory_space<vmem>>, vector<16x128xbf16>
    tpu.vector_store %arg7[%c0_9, %c0_10], %8 {strides = array<i32>} : memref<128x128xbf16, #tpu.memory_space<vmem>>, vector<16x128xbf16>,
    %c0_11 = arith.constant 0 : index
    %c0_12 = arith.constant 0 : index
    %10 = vector.load %arg9[%c0_11, %c0_12] : memref<16x128xf32, #tpu.memory_space<vmem>>, vector<16x128xf32>
    %c0_13 = arith.constant 0 : index
    %c0_14 = arith.constant 0 : index
    %11 = vector.load %arg10[%c0_13, %c0_14] : memref<16x128xf32, #tpu.memory_space<vmem>>, vector<16x128xf32>
    %c0_i32_15 = arith.constant 0 : i32
    %c16_i32 = arith.constant 16 : i32
    %12 = arith.muli %c0_i32_15, %c16_i32 : i32
    %13 = tpu.assume_multiple %12, 16 : i32
    %14 = arith.index_cast %13 : i32 to index
    %c0_16 = arith.constant 0 : index
    %15 = vector.load %arg6[%14, %c0_16] : memref<128x128xf32, #tpu.memory_space<vmem>>, vector<16x128xf32>
    %cst_17 = arith.constant 7.500000e-01 : f32
    %16 = vector.broadcast %cst_17 : f32 to vector<16x128xf32>
    %17 = arith.mulf %10, %16 : vector<16x128xf32>
    %18 = arith.addf %17, %15 : vector<16x128xf32>
    %cst_18 = arith.constant 9.687500e-01 : f32
    %19 = vector.broadcast %cst_18 : f32 to vector<16x128xf32>
    %20 = arith.mulf %11, %19 : vector<16x128xf32>
    %21 = arith.addf %20, %18 : vector<16x128xf32>
    %cst_19 = arith.constant 5.120000e+03 : f32
    %22 = vector.broadcast %cst_19 : f32 to vector<16x128xf32>
    %23 = arith.cmpf oge, %21, %22 : vector<16x128xf32>
    %cst_20 = arith.constant 1.000000e+00 : f32
    %cst_21 = arith.constant 0.000000e+00 : f32
    %24 = vector.broadcast %cst_20 : f32 to vector<16x128xf32>
    %25 = vector.broadcast %cst_21 : f32 to vector<16x128xf32>
    %26 = arith.select %23, %24, %25 : vector<16x128xi1>, vector<16x128xf32>
    %27 = arith.truncf %26 : vector<16x128xf32> to vector<16x128xbf16>
    %c1_i32 = arith.constant 1 : i32
    %28 = arith.addi %c0_i32_15, %c1_i32 : i32
    %c16_i32_22 = arith.constant 16 : i32
    %29 = arith.muli %28, %c16_i32_22 : i32
    %30 = tpu.assume_multiple %29, 16 : i32
    %31 = arith.index_cast %30 : i32 to index
    %c0_23 = arith.constant 0 : index
    %32 = vector.load %arg7[%31, %c0_23] : memref<128x128xbf16, #tpu.memory_space<vmem>>, vector<16x128xbf16>
    tpu.vector_store %arg7[%31, %c0_23], %27 {strides = array<i32>} : memref<128x128xbf16, #tpu.memory_space<vmem>>, vector<16x128xbf16>,
    %cst_24 = arith.constant 0.000000e+00 : f32
    %33 = vector.broadcast %cst_24 : f32 to vector<16x128xf32>
    %34 = arith.select %23, %33, %21 : vector<16x128xi1>, vector<16x128xf32>
    %c1_i32_25 = arith.constant 1 : i32
    %c16_i32_26 = arith.constant 16 : i32
    %35 = arith.muli %c1_i32_25, %c16_i32_26 : i32
    %36 = tpu.assume_multiple %35, 16 : i32
    %37 = arith.index_cast %36 : i32 to index
    %c0_27 = arith.constant 0 : index
    %38 = vector.load %arg6[%37, %c0_27] : memref<128x128xf32, #tpu.memory_space<vmem>>, vector<16x128xf32>
    %cst_28 = arith.constant 7.500000e-01 : f32
    %39 = vector.broadcast %cst_28 : f32 to vector<16x128xf32>
    %40 = arith.mulf %18, %39 : vector<16x128xf32>
    %41 = arith.addf %40, %38 : vector<16x128xf32>
    %cst_29 = arith.constant 9.687500e-01 : f32
    %42 = vector.broadcast %cst_29 : f32 to vector<16x128xf32>
    %43 = arith.mulf %34, %42 : vector<16x128xf32>
    %44 = arith.addf %43, %41 : vector<16x128xf32>
    %cst_30 = arith.constant 5.120000e+03 : f32
    %45 = vector.broadcast %cst_30 : f32 to vector<16x128xf32>
    %46 = arith.cmpf oge, %44, %45 : vector<16x128xf32>
    %cst_31 = arith.constant 1.000000e+00 : f32
    %cst_32 = arith.constant 0.000000e+00 : f32
    %47 = vector.broadcast %cst_31 : f32 to vector<16x128xf32>
    %48 = vector.broadcast %cst_32 : f32 to vector<16x128xf32>
    %49 = arith.select %46, %47, %48 : vector<16x128xi1>, vector<16x128xf32>
    %50 = arith.truncf %49 : vector<16x128xf32> to vector<16x128xbf16>
    %c1_i32_33 = arith.constant 1 : i32
    %51 = arith.addi %c1_i32_25, %c1_i32_33 : i32
    %c16_i32_34 = arith.constant 16 : i32
    %52 = arith.muli %51, %c16_i32_34 : i32
    %53 = tpu.assume_multiple %52, 16 : i32
    %54 = arith.index_cast %53 : i32 to index
    %c0_35 = arith.constant 0 : index
    %55 = vector.load %arg7[%54, %c0_35] : memref<128x128xbf16, #tpu.memory_space<vmem>>, vector<16x128xbf16>
    tpu.vector_store %arg7[%54, %c0_35], %50 {strides = array<i32>} : memref<128x128xbf16, #tpu.memory_space<vmem>>, vector<16x128xbf16>,
    %cst_36 = arith.constant 0.000000e+00 : f32
    %56 = vector.broadcast %cst_36 : f32 to vector<16x128xf32>
    %57 = arith.select %46, %56, %44 : vector<16x128xi1>, vector<16x128xf32>
    %c2_i32 = arith.constant 2 : i32
    %c16_i32_37 = arith.constant 16 : i32
    %58 = arith.muli %c2_i32, %c16_i32_37 : i32
    %59 = tpu.assume_multiple %58, 16 : i32
    %60 = arith.index_cast %59 : i32 to index
    %c0_38 = arith.constant 0 : index
    %61 = vector.load %arg6[%60, %c0_38] : memref<128x128xf32, #tpu.memory_space<vmem>>, vector<16x128xf32>
    %cst_39 = arith.constant 7.500000e-01 : f32
    %62 = vector.broadcast %cst_39 : f32 to vector<16x128xf32>
    %63 = arith.mulf %41, %62 : vector<16x128xf32>
    %64 = arith.addf %63, %61 : vector<16x128xf32>
    %cst_40 = arith.constant 9.687500e-01 : f32
    %65 = vector.broadcast %cst_40 : f32 to vector<16x128xf32>
    %66 = arith.mulf %57, %65 : vector<16x128xf32>
    %67 = arith.addf %66, %64 : vector<16x128xf32>
    %cst_41 = arith.constant 5.120000e+03 : f32
    %68 = vector.broadcast %cst_41 : f32 to vector<16x128xf32>
    %69 = arith.cmpf oge, %67, %68 : vector<16x128xf32>
    %cst_42 = arith.constant 1.000000e+00 : f32
    %cst_43 = arith.constant 0.000000e+00 : f32
    %70 = vector.broadcast %cst_42 : f32 to vector<16x128xf32>
    %71 = vector.broadcast %cst_43 : f32 to vector<16x128xf32>
    %72 = arith.select %69, %70, %71 : vector<16x128xi1>, vector<16x128xf32>
    %73 = arith.truncf %72 : vector<16x128xf32> to vector<16x128xbf16>
    %c1_i32_44 = arith.constant 1 : i32
    %74 = arith.addi %c2_i32, %c1_i32_44 : i32
    %c16_i32_45 = arith.constant 16 : i32
    %75 = arith.muli %74, %c16_i32_45 : i32
    %76 = tpu.assume_multiple %75, 16 : i32
    %77 = arith.index_cast %76 : i32 to index
    %c0_46 = arith.constant 0 : index
    %78 = vector.load %arg7[%77, %c0_46] : memref<128x128xbf16, #tpu.memory_space<vmem>>, vector<16x128xbf16>
    tpu.vector_store %arg7[%77, %c0_46], %73 {strides = array<i32>} : memref<128x128xbf16, #tpu.memory_space<vmem>>, vector<16x128xbf16>,
    %cst_47 = arith.constant 0.000000e+00 : f32
    %79 = vector.broadcast %cst_47 : f32 to vector<16x128xf32>
    %80 = arith.select %69, %79, %67 : vector<16x128xi1>, vector<16x128xf32>
    %c3_i32 = arith.constant 3 : i32
    %c16_i32_48 = arith.constant 16 : i32
    %81 = arith.muli %c3_i32, %c16_i32_48 : i32
    %82 = tpu.assume_multiple %81, 16 : i32
    %83 = arith.index_cast %82 : i32 to index
    %c0_49 = arith.constant 0 : index
    %84 = vector.load %arg6[%83, %c0_49] : memref<128x128xf32, #tpu.memory_space<vmem>>, vector<16x128xf32>
    %cst_50 = arith.constant 7.500000e-01 : f32
    %85 = vector.broadcast %cst_50 : f32 to vector<16x128xf32>
    %86 = arith.mulf %64, %85 : vector<16x128xf32>
    %87 = arith.addf %86, %84 : vector<16x128xf32>
    %cst_51 = arith.constant 9.687500e-01 : f32
    %88 = vector.broadcast %cst_51 : f32 to vector<16x128xf32>
    %89 = arith.mulf %80, %88 : vector<16x128xf32>
    %90 = arith.addf %89, %87 : vector<16x128xf32>
    %cst_52 = arith.constant 5.120000e+03 : f32
    %91 = vector.broadcast %cst_52 : f32 to vector<16x128xf32>
    %92 = arith.cmpf oge, %90, %91 : vector<16x128xf32>
    %cst_53 = arith.constant 1.000000e+00 : f32
    %cst_54 = arith.constant 0.000000e+00 : f32
    %93 = vector.broadcast %cst_53 : f32 to vector<16x128xf32>
    %94 = vector.broadcast %cst_54 : f32 to vector<16x128xf32>
    %95 = arith.select %92, %93, %94 : vector<16x128xi1>, vector<16x128xf32>
    %96 = arith.truncf %95 : vector<16x128xf32> to vector<16x128xbf16>
    %c1_i32_55 = arith.constant 1 : i32
    %97 = arith.addi %c3_i32, %c1_i32_55 : i32
    %c16_i32_56 = arith.constant 16 : i32
    %98 = arith.muli %97, %c16_i32_56 : i32
    %99 = tpu.assume_multiple %98, 16 : i32
    %100 = arith.index_cast %99 : i32 to index
    %c0_57 = arith.constant 0 : index
    %101 = vector.load %arg7[%100, %c0_57] : memref<128x128xbf16, #tpu.memory_space<vmem>>, vector<16x128xbf16>
    tpu.vector_store %arg7[%100, %c0_57], %96 {strides = array<i32>} : memref<128x128xbf16, #tpu.memory_space<vmem>>, vector<16x128xbf16>,
    %cst_58 = arith.constant 0.000000e+00 : f32
    %102 = vector.broadcast %cst_58 : f32 to vector<16x128xf32>
    %103 = arith.select %92, %102, %90 : vector<16x128xi1>, vector<16x128xf32>
    %c4_i32 = arith.constant 4 : i32
    %c16_i32_59 = arith.constant 16 : i32
    %104 = arith.muli %c4_i32, %c16_i32_59 : i32
    %105 = tpu.assume_multiple %104, 16 : i32
    %106 = arith.index_cast %105 : i32 to index
    %c0_60 = arith.constant 0 : index
    %107 = vector.load %arg6[%106, %c0_60] : memref<128x128xf32, #tpu.memory_space<vmem>>, vector<16x128xf32>
    %cst_61 = arith.constant 7.500000e-01 : f32
    %108 = vector.broadcast %cst_61 : f32 to vector<16x128xf32>
    %109 = arith.mulf %87, %108 : vector<16x128xf32>
    %110 = arith.addf %109, %107 : vector<16x128xf32>
    %cst_62 = arith.constant 9.687500e-01 : f32
    %111 = vector.broadcast %cst_62 : f32 to vector<16x128xf32>
    %112 = arith.mulf %103, %111 : vector<16x128xf32>
    %113 = arith.addf %112, %110 : vector<16x128xf32>
    %cst_63 = arith.constant 5.120000e+03 : f32
    %114 = vector.broadcast %cst_63 : f32 to vector<16x128xf32>
    %115 = arith.cmpf oge, %113, %114 : vector<16x128xf32>
    %cst_64 = arith.constant 1.000000e+00 : f32
    %cst_65 = arith.constant 0.000000e+00 : f32
    %116 = vector.broadcast %cst_64 : f32 to vector<16x128xf32>
    %117 = vector.broadcast %cst_65 : f32 to vector<16x128xf32>
    %118 = arith.select %115, %116, %117 : vector<16x128xi1>, vector<16x128xf32>
    %119 = arith.truncf %118 : vector<16x128xf32> to vector<16x128xbf16>
    %c1_i32_66 = arith.constant 1 : i32
    %120 = arith.addi %c4_i32, %c1_i32_66 : i32
    %c16_i32_67 = arith.constant 16 : i32
    %121 = arith.muli %120, %c16_i32_67 : i32
    %122 = tpu.assume_multiple %121, 16 : i32
    %123 = arith.index_cast %122 : i32 to index
    %c0_68 = arith.constant 0 : index
    %124 = vector.load %arg7[%123, %c0_68] : memref<128x128xbf16, #tpu.memory_space<vmem>>, vector<16x128xbf16>
    tpu.vector_store %arg7[%123, %c0_68], %119 {strides = array<i32>} : memref<128x128xbf16, #tpu.memory_space<vmem>>, vector<16x128xbf16>,
    %cst_69 = arith.constant 0.000000e+00 : f32
    %125 = vector.broadcast %cst_69 : f32 to vector<16x128xf32>
    %126 = arith.select %115, %125, %113 : vector<16x128xi1>, vector<16x128xf32>
    %c5_i32 = arith.constant 5 : i32
    %c16_i32_70 = arith.constant 16 : i32
    %127 = arith.muli %c5_i32, %c16_i32_70 : i32
    %128 = tpu.assume_multiple %127, 16 : i32
    %129 = arith.index_cast %128 : i32 to index
    %c0_71 = arith.constant 0 : index
    %130 = vector.load %arg6[%129, %c0_71] : memref<128x128xf32, #tpu.memory_space<vmem>>, vector<16x128xf32>
    %cst_72 = arith.constant 7.500000e-01 : f32
    %131 = vector.broadcast %cst_72 : f32 to vector<16x128xf32>
    %132 = arith.mulf %110, %131 : vector<16x128xf32>
    %133 = arith.addf %132, %130 : vector<16x128xf32>
    %cst_73 = arith.constant 9.687500e-01 : f32
    %134 = vector.broadcast %cst_73 : f32 to vector<16x128xf32>
    %135 = arith.mulf %126, %134 : vector<16x128xf32>
    %136 = arith.addf %135, %133 : vector<16x128xf32>
    %cst_74 = arith.constant 5.120000e+03 : f32
    %137 = vector.broadcast %cst_74 : f32 to vector<16x128xf32>
    %138 = arith.cmpf oge, %136, %137 : vector<16x128xf32>
    %cst_75 = arith.constant 1.000000e+00 : f32
    %cst_76 = arith.constant 0.000000e+00 : f32
    %139 = vector.broadcast %cst_75 : f32 to vector<16x128xf32>
    %140 = vector.broadcast %cst_76 : f32 to vector<16x128xf32>
    %141 = arith.select %138, %139, %140 : vector<16x128xi1>, vector<16x128xf32>
    %142 = arith.truncf %141 : vector<16x128xf32> to vector<16x128xbf16>
    %c1_i32_77 = arith.constant 1 : i32
    %143 = arith.addi %c5_i32, %c1_i32_77 : i32
    %c16_i32_78 = arith.constant 16 : i32
    %144 = arith.muli %143, %c16_i32_78 : i32
    %145 = tpu.assume_multiple %144, 16 : i32
    %146 = arith.index_cast %145 : i32 to index
    %c0_79 = arith.constant 0 : index
    %147 = vector.load %arg7[%146, %c0_79] : memref<128x128xbf16, #tpu.memory_space<vmem>>, vector<16x128xbf16>
    tpu.vector_store %arg7[%146, %c0_79], %142 {strides = array<i32>} : memref<128x128xbf16, #tpu.memory_space<vmem>>, vector<16x128xbf16>,
    %cst_80 = arith.constant 0.000000e+00 : f32
    %148 = vector.broadcast %cst_80 : f32 to vector<16x128xf32>
    %149 = arith.select %138, %148, %136 : vector<16x128xi1>, vector<16x128xf32>
    %c6_i32 = arith.constant 6 : i32
    %c16_i32_81 = arith.constant 16 : i32
    %150 = arith.muli %c6_i32, %c16_i32_81 : i32
    %151 = tpu.assume_multiple %150, 16 : i32
    %152 = arith.index_cast %151 : i32 to index
    %c0_82 = arith.constant 0 : index
    %153 = vector.load %arg6[%152, %c0_82] : memref<128x128xf32, #tpu.memory_space<vmem>>, vector<16x128xf32>
    %cst_83 = arith.constant 7.500000e-01 : f32
    %154 = vector.broadcast %cst_83 : f32 to vector<16x128xf32>
    %155 = arith.mulf %133, %154 : vector<16x128xf32>
    %156 = arith.addf %155, %153 : vector<16x128xf32>
    %cst_84 = arith.constant 9.687500e-01 : f32
    %157 = vector.broadcast %cst_84 : f32 to vector<16x128xf32>
    %158 = arith.mulf %149, %157 : vector<16x128xf32>
    %159 = arith.addf %158, %156 : vector<16x128xf32>
    %cst_85 = arith.constant 5.120000e+03 : f32
    %160 = vector.broadcast %cst_85 : f32 to vector<16x128xf32>
    %161 = arith.cmpf oge, %159, %160 : vector<16x128xf32>
    %cst_86 = arith.constant 1.000000e+00 : f32
    %cst_87 = arith.constant 0.000000e+00 : f32
    %162 = vector.broadcast %cst_86 : f32 to vector<16x128xf32>
    %163 = vector.broadcast %cst_87 : f32 to vector<16x128xf32>
    %164 = arith.select %161, %162, %163 : vector<16x128xi1>, vector<16x128xf32>
    %165 = arith.truncf %164 : vector<16x128xf32> to vector<16x128xbf16>
    %c1_i32_88 = arith.constant 1 : i32
    %166 = arith.addi %c6_i32, %c1_i32_88 : i32
    %c16_i32_89 = arith.constant 16 : i32
    %167 = arith.muli %166, %c16_i32_89 : i32
    %168 = tpu.assume_multiple %167, 16 : i32
    %169 = arith.index_cast %168 : i32 to index
    %c0_90 = arith.constant 0 : index
    %170 = vector.load %arg7[%169, %c0_90] : memref<128x128xbf16, #tpu.memory_space<vmem>>, vector<16x128xbf16>
    tpu.vector_store %arg7[%169, %c0_90], %165 {strides = array<i32>} : memref<128x128xbf16, #tpu.memory_space<vmem>>, vector<16x128xbf16>,
    %cst_91 = arith.constant 0.000000e+00 : f32
    %171 = vector.broadcast %cst_91 : f32 to vector<16x128xf32>
    %172 = arith.select %161, %171, %159 : vector<16x128xi1>, vector<16x128xf32>
    %c7_i32 = arith.constant 7 : i32
    %c112 = arith.constant 112 : index
    %c0_92 = arith.constant 0 : index
    %173 = vector.load %arg6[%c112, %c0_92] : memref<128x128xf32, #tpu.memory_space<vmem>>, vector<16x128xf32>
    %cst_93 = arith.constant 7.500000e-01 : f32
    %174 = vector.broadcast %cst_93 : f32 to vector<16x128xf32>
    %175 = arith.mulf %156, %174 : vector<16x128xf32>
    %176 = arith.addf %175, %173 : vector<16x128xf32>
    %cst_94 = arith.constant 9.687500e-01 : f32
    %177 = vector.broadcast %cst_94 : f32 to vector<16x128xf32>
    %178 = arith.mulf %172, %177 : vector<16x128xf32>
    %179 = arith.addf %178, %176 : vector<16x128xf32>
    %cst_95 = arith.constant 5.120000e+03 : f32
    %180 = vector.broadcast %cst_95 : f32 to vector<16x128xf32>
    %181 = arith.cmpf oge, %179, %180 : vector<16x128xf32>
    %cst_96 = arith.constant 1.000000e+00 : f32
    %cst_97 = arith.constant 0.000000e+00 : f32
    %182 = vector.broadcast %cst_96 : f32 to vector<16x128xf32>
    %183 = vector.broadcast %cst_97 : f32 to vector<16x128xf32>
    %184 = arith.select %181, %182, %183 : vector<16x128xi1>, vector<16x128xf32>
    %185 = arith.truncf %184 : vector<16x128xf32> to vector<16x128xbf16>
    %c0_98 = arith.constant 0 : index
    %c0_99 = arith.constant 0 : index
    %186 = vector.load %arg13[%c0_98, %c0_99] : memref<16x128xbf16, #tpu.memory_space<vmem>>, vector<16x128xbf16>
    tpu.vector_store %arg13[%c0_98, %c0_99], %185 {strides = array<i32>} : memref<16x128xbf16, #tpu.memory_space<vmem>>, vector<16x128xbf16>,
    %c0_100 = arith.constant 0 : index
    %c0_101 = arith.constant 0 : index
    %187 = vector.load %arg9[%c0_100, %c0_101] : memref<16x128xf32, #tpu.memory_space<vmem>>, vector<16x128xf32>
    tpu.vector_store %arg9[%c0_100, %c0_101], %176 {strides = array<i32>} : memref<16x128xf32, #tpu.memory_space<vmem>>, vector<16x128xf32>,
    %cst_102 = arith.constant 0.000000e+00 : f32
    %188 = vector.broadcast %cst_102 : f32 to vector<16x128xf32>
    %189 = arith.select %181, %188, %179 : vector<16x128xi1>, vector<16x128xf32>
    %c0_103 = arith.constant 0 : index
    %c0_104 = arith.constant 0 : index
    %190 = vector.load %arg10[%c0_103, %c0_104] : memref<16x128xf32, #tpu.memory_space<vmem>>, vector<16x128xf32>
    tpu.vector_store %arg10[%c0_103, %c0_104], %189 {strides = array<i32>} : memref<16x128xf32, #tpu.memory_space<vmem>>, vector<16x128xf32>,
    %c0_105 = arith.constant 0 : index
    %c0_106 = arith.constant 0 : index
    %191 = vector.load %arg7[%c0_105, %c0_106] : memref<128x128xbf16, #tpu.memory_space<vmem>>, vector<128x128xbf16>
    %c0_107 = arith.constant 0 : index
    %c0_108 = arith.constant 0 : index
    %192 = vector.load %arg4[%c0_107, %c0_108] : memref<128x128xbf16, #tpu.memory_space<vmem>>, vector<128x128xbf16>
    %cst_109 = arith.constant dense<0.000000e+00> : vector<128x128xf32>
    %193 = tpu.matmul %191, %192, %cst_109 {dimension_numbers = #tpu.dot_dimension_numbers<[1], [0], [0], [1], [0, 0, 1, 1], [], []>} : vector<128x128xbf16>, vector<128x128xbf16>, vector<128x128xf32> -> vector<128x128xf32>
    %c0_110 = arith.constant 0 : index
    %c0_111 = arith.constant 0 : index
    %194 = vector.load %arg8[%c0_110, %c0_111] : memref<128x128xf32, #tpu.memory_space<vmem>>, vector<128x128xf32>
    tpu.vector_store %arg8[%c0_110, %c0_111], %193 {strides = array<i32>} : memref<128x128xf32, #tpu.memory_space<vmem>>, vector<128x128xf32>,
    %c0_112 = arith.constant 0 : index
    %c0_113 = arith.constant 0 : index
    %195 = vector.load %arg14[%c0_112, %c0_113] : memref<16x128xbf16, #tpu.memory_space<vmem>>, vector<16x128xbf16>
    %c0_114 = arith.constant 0 : index
    %c0_115 = arith.constant 0 : index
    %c0_116 = arith.constant 0 : index
    %196 = vector.load %arg5[%c0_114, %c0_115, %c0_116] : memref<1x128x128xbf16, #tpu.memory_space<vmem>>, vector<1x16x128xbf16>
    %197 = vector.shape_cast %196 : vector<1x16x128xbf16> to vector<16x128xbf16>
    %198 = vector.shape_cast %195 : vector<16x128xbf16> to vector<1x16x128xbf16>
    tpu.vector_store %arg5[%c0_114, %c0_115, %c0_116], %198 {strides = array<i32>} : memref<1x128x128xbf16, #tpu.memory_space<vmem>>, vector<1x16x128xbf16>,
    %c0_117 = arith.constant 0 : index
    %c0_118 = arith.constant 0 : index
    %199 = vector.load %arg11[%c0_117, %c0_118] : memref<16x128xf32, #tpu.memory_space<vmem>>, vector<16x128xf32>
    %c0_119 = arith.constant 0 : index
    %c0_120 = arith.constant 0 : index
    %200 = vector.load %arg12[%c0_119, %c0_120] : memref<16x128xf32, #tpu.memory_space<vmem>>, vector<16x128xf32>
    %c0_i32_121 = arith.constant 0 : i32
    %c16_i32_122 = arith.constant 16 : i32
    %201 = arith.muli %c0_i32_121, %c16_i32_122 : i32
    %202 = tpu.assume_multiple %201, 16 : i32
    %203 = arith.index_cast %202 : i32 to index
    %c0_123 = arith.constant 0 : index
    %204 = vector.load %arg8[%203, %c0_123] : memref<128x128xf32, #tpu.memory_space<vmem>>, vector<16x128xf32>
    %cst_124 = arith.constant 7.500000e-01 : f32
    %205 = vector.broadcast %cst_124 : f32 to vector<16x128xf32>
    %206 = arith.mulf %199, %205 : vector<16x128xf32>
    %207 = arith.addf %206, %204 : vector<16x128xf32>
    %cst_125 = arith.constant 9.687500e-01 : f32
    %208 = vector.broadcast %cst_125 : f32 to vector<16x128xf32>
    %209 = arith.mulf %200, %208 : vector<16x128xf32>
    %210 = arith.addf %209, %207 : vector<16x128xf32>
    %cst_126 = arith.constant 5.120000e+03 : f32
    %211 = vector.broadcast %cst_126 : f32 to vector<16x128xf32>
    %212 = arith.cmpf oge, %210, %211 : vector<16x128xf32>
    %cst_127 = arith.constant 1.000000e+00 : f32
    %cst_128 = arith.constant 0.000000e+00 : f32
    %213 = vector.broadcast %cst_127 : f32 to vector<16x128xf32>
    %214 = vector.broadcast %cst_128 : f32 to vector<16x128xf32>
    %215 = arith.select %212, %213, %214 : vector<16x128xi1>, vector<16x128xf32>
    %216 = arith.truncf %215 : vector<16x128xf32> to vector<16x128xbf16>
    %c1_i32_129 = arith.constant 1 : i32
    %217 = arith.addi %c0_i32_121, %c1_i32_129 : i32
    %c16_i32_130 = arith.constant 16 : i32
    %218 = arith.muli %217, %c16_i32_130 : i32
    %219 = tpu.assume_multiple %218, 16 : i32
    %c0_131 = arith.constant 0 : index
    %220 = arith.index_cast %219 : i32 to index
    %c0_132 = arith.constant 0 : index
    %221 = vector.load %arg5[%c0_131, %220, %c0_132] : memref<1x128x128xbf16, #tpu.memory_space<vmem>>, vector<1x16x128xbf16>
    %222 = vector.shape_cast %221 : vector<1x16x128xbf16> to vector<16x128xbf16>
    %223 = vector.shape_cast %216 : vector<16x128xbf16> to vector<1x16x128xbf16>
    tpu.vector_store %arg5[%c0_131, %220, %c0_132], %223 {strides = array<i32>} : memref<1x128x128xbf16, #tpu.memory_space<vmem>>, vector<1x16x128xbf16>,
    %cst_133 = arith.constant 0.000000e+00 : f32
    %224 = vector.broadcast %cst_133 : f32 to vector<16x128xf32>
    %225 = arith.select %212, %224, %210 : vector<16x128xi1>, vector<16x128xf32>
    %c1_i32_134 = arith.constant 1 : i32
    %c16_i32_135 = arith.constant 16 : i32
    %226 = arith.muli %c1_i32_134, %c16_i32_135 : i32
    %227 = tpu.assume_multiple %226, 16 : i32
    %228 = arith.index_cast %227 : i32 to index
    %c0_136 = arith.constant 0 : index
    %229 = vector.load %arg8[%228, %c0_136] : memref<128x128xf32, #tpu.memory_space<vmem>>, vector<16x128xf32>
    %cst_137 = arith.constant 7.500000e-01 : f32
    %230 = vector.broadcast %cst_137 : f32 to vector<16x128xf32>
    %231 = arith.mulf %207, %230 : vector<16x128xf32>
    %232 = arith.addf %231, %229 : vector<16x128xf32>
    %cst_138 = arith.constant 9.687500e-01 : f32
    %233 = vector.broadcast %cst_138 : f32 to vector<16x128xf32>
    %234 = arith.mulf %225, %233 : vector<16x128xf32>
    %235 = arith.addf %234, %232 : vector<16x128xf32>
    %cst_139 = arith.constant 5.120000e+03 : f32
    %236 = vector.broadcast %cst_139 : f32 to vector<16x128xf32>
    %237 = arith.cmpf oge, %235, %236 : vector<16x128xf32>
    %cst_140 = arith.constant 1.000000e+00 : f32
    %cst_141 = arith.constant 0.000000e+00 : f32
    %238 = vector.broadcast %cst_140 : f32 to vector<16x128xf32>
    %239 = vector.broadcast %cst_141 : f32 to vector<16x128xf32>
    %240 = arith.select %237, %238, %239 : vector<16x128xi1>, vector<16x128xf32>
    %241 = arith.truncf %240 : vector<16x128xf32> to vector<16x128xbf16>
    %c1_i32_142 = arith.constant 1 : i32
    %242 = arith.addi %c1_i32_134, %c1_i32_142 : i32
    %c16_i32_143 = arith.constant 16 : i32
    %243 = arith.muli %242, %c16_i32_143 : i32
    %244 = tpu.assume_multiple %243, 16 : i32
    %c0_144 = arith.constant 0 : index
    %245 = arith.index_cast %244 : i32 to index
    %c0_145 = arith.constant 0 : index
    %246 = vector.load %arg5[%c0_144, %245, %c0_145] : memref<1x128x128xbf16, #tpu.memory_space<vmem>>, vector<1x16x128xbf16>
    %247 = vector.shape_cast %246 : vector<1x16x128xbf16> to vector<16x128xbf16>
    %248 = vector.shape_cast %241 : vector<16x128xbf16> to vector<1x16x128xbf16>
    tpu.vector_store %arg5[%c0_144, %245, %c0_145], %248 {strides = array<i32>} : memref<1x128x128xbf16, #tpu.memory_space<vmem>>, vector<1x16x128xbf16>,
    %cst_146 = arith.constant 0.000000e+00 : f32
    %249 = vector.broadcast %cst_146 : f32 to vector<16x128xf32>
    %250 = arith.select %237, %249, %235 : vector<16x128xi1>, vector<16x128xf32>
    %c2_i32_147 = arith.constant 2 : i32
    %c16_i32_148 = arith.constant 16 : i32
    %251 = arith.muli %c2_i32_147, %c16_i32_148 : i32
    %252 = tpu.assume_multiple %251, 16 : i32
    %253 = arith.index_cast %252 : i32 to index
    %c0_149 = arith.constant 0 : index
    %254 = vector.load %arg8[%253, %c0_149] : memref<128x128xf32, #tpu.memory_space<vmem>>, vector<16x128xf32>
    %cst_150 = arith.constant 7.500000e-01 : f32
    %255 = vector.broadcast %cst_150 : f32 to vector<16x128xf32>
    %256 = arith.mulf %232, %255 : vector<16x128xf32>
    %257 = arith.addf %256, %254 : vector<16x128xf32>
    %cst_151 = arith.constant 9.687500e-01 : f32
    %258 = vector.broadcast %cst_151 : f32 to vector<16x128xf32>
    %259 = arith.mulf %250, %258 : vector<16x128xf32>
    %260 = arith.addf %259, %257 : vector<16x128xf32>
    %cst_152 = arith.constant 5.120000e+03 : f32
    %261 = vector.broadcast %cst_152 : f32 to vector<16x128xf32>
    %262 = arith.cmpf oge, %260, %261 : vector<16x128xf32>
    %cst_153 = arith.constant 1.000000e+00 : f32
    %cst_154 = arith.constant 0.000000e+00 : f32
    %263 = vector.broadcast %cst_153 : f32 to vector<16x128xf32>
    %264 = vector.broadcast %cst_154 : f32 to vector<16x128xf32>
    %265 = arith.select %262, %263, %264 : vector<16x128xi1>, vector<16x128xf32>
    %266 = arith.truncf %265 : vector<16x128xf32> to vector<16x128xbf16>
    %c1_i32_155 = arith.constant 1 : i32
    %267 = arith.addi %c2_i32_147, %c1_i32_155 : i32
    %c16_i32_156 = arith.constant 16 : i32
    %268 = arith.muli %267, %c16_i32_156 : i32
    %269 = tpu.assume_multiple %268, 16 : i32
    %c0_157 = arith.constant 0 : index
    %270 = arith.index_cast %269 : i32 to index
    %c0_158 = arith.constant 0 : index
    %271 = vector.load %arg5[%c0_157, %270, %c0_158] : memref<1x128x128xbf16, #tpu.memory_space<vmem>>, vector<1x16x128xbf16>
    %272 = vector.shape_cast %271 : vector<1x16x128xbf16> to vector<16x128xbf16>
    %273 = vector.shape_cast %266 : vector<16x128xbf16> to vector<1x16x128xbf16>
    tpu.vector_store %arg5[%c0_157, %270, %c0_158], %273 {strides = array<i32>} : memref<1x128x128xbf16, #tpu.memory_space<vmem>>, vector<1x16x128xbf16>,
    %cst_159 = arith.constant 0.000000e+00 : f32
    %274 = vector.broadcast %cst_159 : f32 to vector<16x128xf32>
    %275 = arith.select %262, %274, %260 : vector<16x128xi1>, vector<16x128xf32>
    %c3_i32_160 = arith.constant 3 : i32
    %c16_i32_161 = arith.constant 16 : i32
    %276 = arith.muli %c3_i32_160, %c16_i32_161 : i32
    %277 = tpu.assume_multiple %276, 16 : i32
    %278 = arith.index_cast %277 : i32 to index
    %c0_162 = arith.constant 0 : index
    %279 = vector.load %arg8[%278, %c0_162] : memref<128x128xf32, #tpu.memory_space<vmem>>, vector<16x128xf32>
    %cst_163 = arith.constant 7.500000e-01 : f32
    %280 = vector.broadcast %cst_163 : f32 to vector<16x128xf32>
    %281 = arith.mulf %257, %280 : vector<16x128xf32>
    %282 = arith.addf %281, %279 : vector<16x128xf32>
    %cst_164 = arith.constant 9.687500e-01 : f32
    %283 = vector.broadcast %cst_164 : f32 to vector<16x128xf32>
    %284 = arith.mulf %275, %283 : vector<16x128xf32>
    %285 = arith.addf %284, %282 : vector<16x128xf32>
    %cst_165 = arith.constant 5.120000e+03 : f32
    %286 = vector.broadcast %cst_165 : f32 to vector<16x128xf32>
    %287 = arith.cmpf oge, %285, %286 : vector<16x128xf32>
    %cst_166 = arith.constant 1.000000e+00 : f32
    %cst_167 = arith.constant 0.000000e+00 : f32
    %288 = vector.broadcast %cst_166 : f32 to vector<16x128xf32>
    %289 = vector.broadcast %cst_167 : f32 to vector<16x128xf32>
    %290 = arith.select %287, %288, %289 : vector<16x128xi1>, vector<16x128xf32>
    %291 = arith.truncf %290 : vector<16x128xf32> to vector<16x128xbf16>
    %c1_i32_168 = arith.constant 1 : i32
    %292 = arith.addi %c3_i32_160, %c1_i32_168 : i32
    %c16_i32_169 = arith.constant 16 : i32
    %293 = arith.muli %292, %c16_i32_169 : i32
    %294 = tpu.assume_multiple %293, 16 : i32
    %c0_170 = arith.constant 0 : index
    %295 = arith.index_cast %294 : i32 to index
    %c0_171 = arith.constant 0 : index
    %296 = vector.load %arg5[%c0_170, %295, %c0_171] : memref<1x128x128xbf16, #tpu.memory_space<vmem>>, vector<1x16x128xbf16>
    %297 = vector.shape_cast %296 : vector<1x16x128xbf16> to vector<16x128xbf16>
    %298 = vector.shape_cast %291 : vector<16x128xbf16> to vector<1x16x128xbf16>
    tpu.vector_store %arg5[%c0_170, %295, %c0_171], %298 {strides = array<i32>} : memref<1x128x128xbf16, #tpu.memory_space<vmem>>, vector<1x16x128xbf16>,
    %cst_172 = arith.constant 0.000000e+00 : f32
    %299 = vector.broadcast %cst_172 : f32 to vector<16x128xf32>
    %300 = arith.select %287, %299, %285 : vector<16x128xi1>, vector<16x128xf32>
    %c4_i32_173 = arith.constant 4 : i32
    %c16_i32_174 = arith.constant 16 : i32
    %301 = arith.muli %c4_i32_173, %c16_i32_174 : i32
    %302 = tpu.assume_multiple %301, 16 : i32
    %303 = arith.index_cast %302 : i32 to index
    %c0_175 = arith.constant 0 : index
    %304 = vector.load %arg8[%303, %c0_175] : memref<128x128xf32, #tpu.memory_space<vmem>>, vector<16x128xf32>
    %cst_176 = arith.constant 7.500000e-01 : f32
    %305 = vector.broadcast %cst_176 : f32 to vector<16x128xf32>
    %306 = arith.mulf %282, %305 : vector<16x128xf32>
    %307 = arith.addf %306, %304 : vector<16x128xf32>
    %cst_177 = arith.constant 9.687500e-01 : f32
    %308 = vector.broadcast %cst_177 : f32 to vector<16x128xf32>
    %309 = arith.mulf %300, %308 : vector<16x128xf32>
    %310 = arith.addf %309, %307 : vector<16x128xf32>
    %cst_178 = arith.constant 5.120000e+03 : f32
    %311 = vector.broadcast %cst_178 : f32 to vector<16x128xf32>
    %312 = arith.cmpf oge, %310, %311 : vector<16x128xf32>
    %cst_179 = arith.constant 1.000000e+00 : f32
    %cst_180 = arith.constant 0.000000e+00 : f32
    %313 = vector.broadcast %cst_179 : f32 to vector<16x128xf32>
    %314 = vector.broadcast %cst_180 : f32 to vector<16x128xf32>
    %315 = arith.select %312, %313, %314 : vector<16x128xi1>, vector<16x128xf32>
    %316 = arith.truncf %315 : vector<16x128xf32> to vector<16x128xbf16>
    %c1_i32_181 = arith.constant 1 : i32
    %317 = arith.addi %c4_i32_173, %c1_i32_181 : i32
    %c16_i32_182 = arith.constant 16 : i32
    %318 = arith.muli %317, %c16_i32_182 : i32
    %319 = tpu.assume_multiple %318, 16 : i32
    %c0_183 = arith.constant 0 : index
    %320 = arith.index_cast %319 : i32 to index
    %c0_184 = arith.constant 0 : index
    %321 = vector.load %arg5[%c0_183, %320, %c0_184] : memref<1x128x128xbf16, #tpu.memory_space<vmem>>, vector<1x16x128xbf16>
    %322 = vector.shape_cast %321 : vector<1x16x128xbf16> to vector<16x128xbf16>
    %323 = vector.shape_cast %316 : vector<16x128xbf16> to vector<1x16x128xbf16>
    tpu.vector_store %arg5[%c0_183, %320, %c0_184], %323 {strides = array<i32>} : memref<1x128x128xbf16, #tpu.memory_space<vmem>>, vector<1x16x128xbf16>,
    %cst_185 = arith.constant 0.000000e+00 : f32
    %324 = vector.broadcast %cst_185 : f32 to vector<16x128xf32>
    %325 = arith.select %312, %324, %310 : vector<16x128xi1>, vector<16x128xf32>
    %c5_i32_186 = arith.constant 5 : i32
    %c16_i32_187 = arith.constant 16 : i32
    %326 = arith.muli %c5_i32_186, %c16_i32_187 : i32
    %327 = tpu.assume_multiple %326, 16 : i32
    %328 = arith.index_cast %327 : i32 to index
    %c0_188 = arith.constant 0 : index
    %329 = vector.load %arg8[%328, %c0_188] : memref<128x128xf32, #tpu.memory_space<vmem>>, vector<16x128xf32>
    %cst_189 = arith.constant 7.500000e-01 : f32
    %330 = vector.broadcast %cst_189 : f32 to vector<16x128xf32>
    %331 = arith.mulf %307, %330 : vector<16x128xf32>
    %332 = arith.addf %331, %329 : vector<16x128xf32>
    %cst_190 = arith.constant 9.687500e-01 : f32
    %333 = vector.broadcast %cst_190 : f32 to vector<16x128xf32>
    %334 = arith.mulf %325, %333 : vector<16x128xf32>
    %335 = arith.addf %334, %332 : vector<16x128xf32>
    %cst_191 = arith.constant 5.120000e+03 : f32
    %336 = vector.broadcast %cst_191 : f32 to vector<16x128xf32>
    %337 = arith.cmpf oge, %335, %336 : vector<16x128xf32>
    %cst_192 = arith.constant 1.000000e+00 : f32
    %cst_193 = arith.constant 0.000000e+00 : f32
    %338 = vector.broadcast %cst_192 : f32 to vector<16x128xf32>
    %339 = vector.broadcast %cst_193 : f32 to vector<16x128xf32>
    %340 = arith.select %337, %338, %339 : vector<16x128xi1>, vector<16x128xf32>
    %341 = arith.truncf %340 : vector<16x128xf32> to vector<16x128xbf16>
    %c1_i32_194 = arith.constant 1 : i32
    %342 = arith.addi %c5_i32_186, %c1_i32_194 : i32
    %c16_i32_195 = arith.constant 16 : i32
    %343 = arith.muli %342, %c16_i32_195 : i32
    %344 = tpu.assume_multiple %343, 16 : i32
    %c0_196 = arith.constant 0 : index
    %345 = arith.index_cast %344 : i32 to index
    %c0_197 = arith.constant 0 : index
    %346 = vector.load %arg5[%c0_196, %345, %c0_197] : memref<1x128x128xbf16, #tpu.memory_space<vmem>>, vector<1x16x128xbf16>
    %347 = vector.shape_cast %346 : vector<1x16x128xbf16> to vector<16x128xbf16>
    %348 = vector.shape_cast %341 : vector<16x128xbf16> to vector<1x16x128xbf16>
    tpu.vector_store %arg5[%c0_196, %345, %c0_197], %348 {strides = array<i32>} : memref<1x128x128xbf16, #tpu.memory_space<vmem>>, vector<1x16x128xbf16>,
    %cst_198 = arith.constant 0.000000e+00 : f32
    %349 = vector.broadcast %cst_198 : f32 to vector<16x128xf32>
    %350 = arith.select %337, %349, %335 : vector<16x128xi1>, vector<16x128xf32>
    %c6_i32_199 = arith.constant 6 : i32
    %c16_i32_200 = arith.constant 16 : i32
    %351 = arith.muli %c6_i32_199, %c16_i32_200 : i32
    %352 = tpu.assume_multiple %351, 16 : i32
    %353 = arith.index_cast %352 : i32 to index
    %c0_201 = arith.constant 0 : index
    %354 = vector.load %arg8[%353, %c0_201] : memref<128x128xf32, #tpu.memory_space<vmem>>, vector<16x128xf32>
    %cst_202 = arith.constant 7.500000e-01 : f32
    %355 = vector.broadcast %cst_202 : f32 to vector<16x128xf32>
    %356 = arith.mulf %332, %355 : vector<16x128xf32>
    %357 = arith.addf %356, %354 : vector<16x128xf32>
    %cst_203 = arith.constant 9.687500e-01 : f32
    %358 = vector.broadcast %cst_203 : f32 to vector<16x128xf32>
    %359 = arith.mulf %350, %358 : vector<16x128xf32>
    %360 = arith.addf %359, %357 : vector<16x128xf32>
    %cst_204 = arith.constant 5.120000e+03 : f32
    %361 = vector.broadcast %cst_204 : f32 to vector<16x128xf32>
    %362 = arith.cmpf oge, %360, %361 : vector<16x128xf32>
    %cst_205 = arith.constant 1.000000e+00 : f32
    %cst_206 = arith.constant 0.000000e+00 : f32
    %363 = vector.broadcast %cst_205 : f32 to vector<16x128xf32>
    %364 = vector.broadcast %cst_206 : f32 to vector<16x128xf32>
    %365 = arith.select %362, %363, %364 : vector<16x128xi1>, vector<16x128xf32>
    %366 = arith.truncf %365 : vector<16x128xf32> to vector<16x128xbf16>
    %c1_i32_207 = arith.constant 1 : i32
    %367 = arith.addi %c6_i32_199, %c1_i32_207 : i32
    %c16_i32_208 = arith.constant 16 : i32
    %368 = arith.muli %367, %c16_i32_208 : i32
    %369 = tpu.assume_multiple %368, 16 : i32
    %c0_209 = arith.constant 0 : index
    %370 = arith.index_cast %369 : i32 to index
    %c0_210 = arith.constant 0 : index
    %371 = vector.load %arg5[%c0_209, %370, %c0_210] : memref<1x128x128xbf16, #tpu.memory_space<vmem>>, vector<1x16x128xbf16>
    %372 = vector.shape_cast %371 : vector<1x16x128xbf16> to vector<16x128xbf16>
    %373 = vector.shape_cast %366 : vector<16x128xbf16> to vector<1x16x128xbf16>
    tpu.vector_store %arg5[%c0_209, %370, %c0_210], %373 {strides = array<i32>} : memref<1x128x128xbf16, #tpu.memory_space<vmem>>, vector<1x16x128xbf16>,
    %cst_211 = arith.constant 0.000000e+00 : f32
    %374 = vector.broadcast %cst_211 : f32 to vector<16x128xf32>
    %375 = arith.select %362, %374, %360 : vector<16x128xi1>, vector<16x128xf32>
    %c7_i32_212 = arith.constant 7 : i32
    %c112_213 = arith.constant 112 : index
    %c0_214 = arith.constant 0 : index
    %376 = vector.load %arg8[%c112_213, %c0_214] : memref<128x128xf32, #tpu.memory_space<vmem>>, vector<16x128xf32>
    %cst_215 = arith.constant 7.500000e-01 : f32
    %377 = vector.broadcast %cst_215 : f32 to vector<16x128xf32>
    %378 = arith.mulf %357, %377 : vector<16x128xf32>
    %379 = arith.addf %378, %376 : vector<16x128xf32>
    %cst_216 = arith.constant 9.687500e-01 : f32
    %380 = vector.broadcast %cst_216 : f32 to vector<16x128xf32>
    %381 = arith.mulf %375, %380 : vector<16x128xf32>
    %382 = arith.addf %381, %379 : vector<16x128xf32>
    %cst_217 = arith.constant 5.120000e+03 : f32
    %383 = vector.broadcast %cst_217 : f32 to vector<16x128xf32>
    %384 = arith.cmpf oge, %382, %383 : vector<16x128xf32>
    %cst_218 = arith.constant 1.000000e+00 : f32
    %cst_219 = arith.constant 0.000000e+00 : f32
    %385 = vector.broadcast %cst_218 : f32 to vector<16x128xf32>
    %386 = vector.broadcast %cst_219 : f32 to vector<16x128xf32>
    %387 = arith.select %384, %385, %386 : vector<16x128xi1>, vector<16x128xf32>
    %388 = arith.truncf %387 : vector<16x128xf32> to vector<16x128xbf16>
    %c0_220 = arith.constant 0 : index
    %c0_221 = arith.constant 0 : index
    %389 = vector.load %arg14[%c0_220, %c0_221] : memref<16x128xbf16, #tpu.memory_space<vmem>>, vector<16x128xbf16>
    tpu.vector_store %arg14[%c0_220, %c0_221], %388 {strides = array<i32>} : memref<16x128xbf16, #tpu.memory_space<vmem>>, vector<16x128xbf16>,
    %c0_222 = arith.constant 0 : index
    %c0_223 = arith.constant 0 : index
    %390 = vector.load %arg11[%c0_222, %c0_223] : memref<16x128xf32, #tpu.memory_space<vmem>>, vector<16x128xf32>
    tpu.vector_store %arg11[%c0_222, %c0_223], %379 {strides = array<i32>} : memref<16x128xf32, #tpu.memory_space<vmem>>, vector<16x128xf32>,
    %cst_224 = arith.constant 0.000000e+00 : f32
    %391 = vector.broadcast %cst_224 : f32 to vector<16x128xf32>
    %392 = arith.select %384, %391, %382 : vector<16x128xi1>, vector<16x128xf32>
    %c0_225 = arith.constant 0 : index
    %c0_226 = arith.constant 0 : index
    %393 = vector.load %arg12[%c0_225, %c0_226] : memref<16x128xf32, #tpu.memory_space<vmem>>, vector<16x128xf32>
    tpu.vector_store %arg12[%c0_225, %c0_226], %392 {strides = array<i32>} : memref<16x128xf32, #tpu.memory_space<vmem>>, vector<16x128xf32>,
    return
  }
  func.func @transform_0(%arg0: i32, %arg1: i32) -> (i32, i32, i32) {
    %c0_i32 = arith.constant 0 : i32
    %c0_i32_0 = arith.constant 0 : i32
    return %arg0, %arg1, %c0_i32 : i32, i32, i32
  }
  func.func @transform_1(%arg0: i32, %arg1: i32) -> (i32, i32) {
    %c0_i32 = arith.constant 0 : i32
    %c0_i32_0 = arith.constant 0 : i32
    %c0_i32_1 = arith.constant 0 : i32
    return %c0_i32, %c0_i32_0 : i32, i32
  }
  func.func @transform_2(%arg0: i32, %arg1: i32) -> (i32, i32) {
    %c0_i32 = arith.constant 0 : i32
    %c0_i32_0 = arith.constant 0 : i32
    %c0_i32_1 = arith.constant 0 : i32
    return %c0_i32, %c0_i32_0 : i32, i32
  }
  func.func @transform_3(%arg0: i32, %arg1: i32) -> (i32, i32, i32) {
    %c0_i32 = arith.constant 0 : i32
    %c0_i32_0 = arith.constant 0 : i32
    return %arg0, %arg1, %c0_i32 : i32, i32, i32
  }
}

</mosaic_0001>

<bundles_post_ra>
// kernel: snn_forward.1
= control target key start
LH: loop header
LB: loop body
LE: loop exit
PB: predicated region body
PF: predicated region fallthrough
CT: control target
= control target key end

     0   :  { %s1456_s12 = smov 0   ;;  %s1458_s13 = smov 0   ;;  %s1583_s0 = inlined_call_operand.vmem [shape: bf16[1,512,128], index: 0, kind: input, shape index: {}]   ;;  %s1584_s1 = inlined_call_operand.vmem [shape: bf16[128,128], index: 1, kind: input, shape index: {}]   ;;  %s1585_s2 = inlined_call_operand.vmem [shape: bf16[128,128], index: 2, kind: input, shape index: {}]   ;;  %s1586_s3 = inlined_call_operand.vmem [shape: bf16[1,512,128], index: 3, kind: output, shape index: {}]  }
   0x1   :  { %s1460_s14 = smov 0  }
   0x2 LB: > { %s22_s15 = sadd.s32 1, %s1426_s13  ;;  %p1140_p0 = scmp.ge.s32.totalorder %s1430_s14, 1  ;;  %s1430_s14 = sphi %s1460_s14, %s13_s14   ;;  %s1426_s13 = sphi %s1458_s13, %s1588_s13   ;;  %s1422_s12 = sphi %s1456_s12, %s1587_s12  }
   0x3   : > { %p23_p1 = scmp.ge.s32.totalorder %s22_s15, 4  ;;  %p158_p2 = scmp.lt.s32.totalorder %s1430_s14, 5 }
   0x5   : > { %s1590_s15 = smov (%p23_p1, %s22_s15), 0  ;;  %p159_p3 = pnand %p1140_p0, %p158_p2 }
   0x6   : > { %s1141_s16 = sshll.u32 (!%p159_p3), %s1422_s12, 4  ;;  %p1145_p5 = scmp.ne.s32.totalorder (!%p159_p3), %s1422_s12, 0 }
   0x7   : > { %162 = sbr.rel (%p159_p3) target bundleno = 542 (0x21e), region = 32  ;;  %p193_p4 = scmp.lt.s32.totalorder (!%p159_p3), %s1141_s16, 63 }
   0xe   : > { %s1592_s16 = smov (!%p193_p4, %s1141_s16), 63  ;;  %214 = sbr.rel (%p1145_p5) target bundleno = 21 (0x15), region = 36 }
   0xf   : > { %s1142_s17 = sshll.u32 %s1592_s16, 2  ;;  %v1432_v0 = vmov (!%p1145_p5), 0.0   ;;  %v1433_v1 = vmov (!%p1145_p5), 0  }
  0x10   : > { %s1477_s20 = scalar_lea.vmem %s1583_s0, %s1142_s17  ;;  %s1482_s23 = scalar_lea.vmem %s1586_s3, %s1142_s17  ;;  %215 = vst [vmem:[#allocation5] sm:$0xff] (!%p1145_p5), %v1432_v0  ;;  %216 = vst [vmem:[#allocation5 + $0x8] sm:$0xff] (!%p1145_p5), %v1432_v0 }
  0x11   : > { %217 = vst [vmem:[#allocation6] sm:$0xff] (!%p1145_p5), %v1432_v0  ;;  %218 = vst [vmem:[#allocation6 + $0x8] sm:$0xff] (!%p1145_p5), %v1432_v0 }
  0x12   : > { %219 = vst [vmem:[#allocation7] sm:$0xff] (!%p1145_p5), %v1432_v0  ;;  %220 = vst [vmem:[#allocation7 + $0x8] sm:$0xff] (!%p1145_p5), %v1432_v0 }
  0x13   : > { %221 = vst [vmem:[#allocation8] sm:$0xff] (!%p1145_p5), %v1432_v0  ;;  %222 = vst [vmem:[#allocation8 + $0x8] sm:$0xff] (!%p1145_p5), %v1432_v0 }
  0x14   : > { %223 = vst [vmem:[#allocation9] sm:$0xff] (!%p1145_p5), %v1433_v1  ;;  %224 = vst [vmem:[#allocation10] sm:$0xff] (!%p1145_p5), %v1433_v1 }
  0x15 PF: > { %v1382_v2 = vld [vmem:[%s1584_s1] sm:$0xff]   ;;  %v1383_v3 = vld [vmem:[%s1584_s1 + $0x8] sm:$0xff]   ;;  %v1384_v4 = vld [vmem:[%s1584_s1 + $0x10] sm:$0xff]   ;;  %v1434_v57 = vmov 1.0|1.0  }
  0x16   : > { %1290 = vmatprep.subr.bf16.mxu0 %v1382_v2  ;;  %v1385_v5 = vld [vmem:[%s1584_s1 + $0x18] sm:$0xff]   ;;  %v1390_v6 = vld [vmem:[%s1477_s20] sm:$0xff]   ;;  %v1387_v8 = vld [vmem:[%s1584_s1 + $0x28] sm:$0xff]  }
  0x17   : > { %1291 = vmatpush3.bf16.msra.mxu0 %v1382_v2  ;;  %1306 = vmatprep.mubr.bf16.mxu0 %v1390_v6  ;;  %v1386_v7 = vld [vmem:[%s1584_s1 + $0x20] sm:$0xff]   ;;  %v1399_v10 = vld [vmem:[%s1585_s2 + $0x8] sm:$0xff]   ;;  %v1388_v11 = vld [vmem:[%s1584_s1 + $0x30] sm:$0xff]  }
  0x18   : > { %1292 = vmatprep.subr.bf16.mxu0 %v1383_v3  ;;  %v1398_v9 = vld [vmem:[%s1585_s2] sm:$0xff]   ;;  %v1400_v12 = vld [vmem:[%s1585_s2 + $0x10] sm:$0xff]   ;;  %v1389_v13 = vld [vmem:[%s1584_s1 + $0x38] sm:$0xff]  }
  0x19   : > { %1322 = vmatprep.subr.bf16.mxu1 %v1398_v9  ;;  %v1401_v14 = vld [vmem:[%s1585_s2 + $0x18] sm:$0xff]   ;;  %v1402_v15 = vld [vmem:[%s1585_s2 + $0x20] sm:$0xff]   ;;  %v1391_v16 = vld [vmem:[%s1477_s20 + $0x8] sm:$0xff]  }
  0x1a   : > { %1323 = vmatpush3.bf16.msra.mxu1 %v1398_v9  ;;  %v1392_v17 = vld [vmem:[%s1477_s20 + $0x10] sm:$0xff]   ;;  %v1403_v18 = vld [vmem:[%s1585_s2 + $0x28] sm:$0xff]   ;;  %v1393_v19 = vld [vmem:[%s1477_s20 + $0x18] sm:$0xff]  }
  0x1b   : > { %1293 = vmatpush3.bf16.msra.mxu0 %v1383_v3  ;;  %1324 = vmatprep.subr.bf16.mxu1 %v1399_v10  ;;  %v1394_v20 = vld [vmem:[%s1477_s20 + $0x20] sm:$0xff]   ;;  %v1395_v21 = vld [vmem:[%s1477_s20 + $0x28] sm:$0xff]   ;;  %v1396_v22 = vld [vmem:[%s1477_s20 + $0x30] sm:$0xff]  }
  0x1c   : > { %1294 = vmatprep.subr.bf16.mxu0 %v1384_v4  ;;  %v1397_v23 = vld [vmem:[%s1477_s20 + $0x38] sm:$0xff]   ;;  %v1404_v24 = vld [vmem:[%s1585_s2 + $0x30] sm:$0xff]   ;;  %v466_v26 = vld [vmem:[#allocation9] sm:$0xff] }
  0x1d   : > { %v1405_v25 = vld [vmem:[%s1585_s2 + $0x38] sm:$0xff]   ;;  %1338 = vmatprep.mubr.bf16.mxu1 %v466_v26  ;;  %v468_v27 = vld [vmem:[#allocation5] sm:$0xff]  ;;  %v470_v28 = vld [vmem:[#allocation6] sm:$0xff] }
  0x1e   : > { %1325 = vmatpush3.bf16.msra.mxu1 %v1399_v10  ;;  %v469_v29 = vld [vmem:[#allocation5 + $0x8] sm:$0xff]  ;;  %v474_v30 = vmul.f32 0.75, %v468_v27  ;;  %v471_v31 = vld [vmem:[#allocation6 + $0x8] sm:$0xff]  ;;  %v478_v33 = vmul.f32 0.96875, %v470_v28 }
  0x1f   : > { %1295 = vmatpush3.bf16.msra.mxu0 %v1384_v4  ;;  %1326 = vmatprep.subr.bf16.mxu1 %v1400_v12  ;;  %v475_v34 = vmul.f32 0.75, %v469_v29  ;;  %v479_v38 = vmul.f32 0.96875, %v471_v31 }
  0x20   : > { %1296 = vmatprep.subr.bf16.mxu0 %v1385_v5 }
  0x22   : > { %1327 = vmatpush3.bf16.msra.mxu1 %v1400_v12 }
  0x23   : > { %1297 = vmatpush3.bf16.msra.mxu0 %v1385_v5  ;;  %1328 = vmatprep.subr.bf16.mxu1 %v1401_v14 }
  0x24   : > { %1298 = vmatprep.subr.bf16.mxu0 %v1386_v7 }
  0x26   : > { %1329 = vmatpush3.bf16.msra.mxu1 %v1401_v14 }
  0x27   : > { %1299 = vmatpush3.bf16.msra.mxu0 %v1386_v7  ;;  %1330 = vmatprep.subr.bf16.mxu1 %v1402_v15 }
  0x28   : > { %1300 = vmatprep.subr.bf16.mxu0 %v1387_v8 }
  0x2a   : > { %1331 = vmatpush3.bf16.msra.mxu1 %v1402_v15 }
  0x2b   : > { %1301 = vmatpush3.bf16.msra.mxu0 %v1387_v8  ;;  %1332 = vmatprep.subr.bf16.mxu1 %v1403_v18 }
  0x2c   : > { %1302 = vmatprep.subr.bf16.mxu0 %v1388_v11 }
  0x2e   : > { %1333 = vmatpush3.bf16.msra.mxu1 %v1403_v18 }
  0x2f   : > { %1303 = vmatpush3.bf16.msra.mxu0 %v1388_v11  ;;  %1334 = vmatprep.subr.bf16.mxu1 %v1404_v24 }
  0x30   : > { %1304 = vmatprep.subr.bf16.mxu0 %v1389_v13 }
  0x32   : > { %1335 = vmatpush3.bf16.msra.mxu1 %v1404_v24 }
  0x33   : > { %1305 = vmatpush3.bf16.msra.mxu0 %v1389_v13  ;;  %1336 = vmatprep.subr.bf16.mxu1 %v1405_v25 }
  0x36   : > { %1307 = vmatmul.mubr.bf16.vlgmr.msra.gmra.mrb[0].mxu0 %v1391_v16  ;;  %1337 = vmatpush3.bf16.msra.mxu1 %v1405_v25 }
  0x37   : > { %1310 = vmatprep.mubr.bf16.mxu0 %v1392_v17 }
  0x3e   : > { %1311 = vmatmul.mubr.bf16.gmra.mrb[4].mxu0 %v1393_v19 }
  0x3f   : > { %1314 = vmatprep.mubr.bf16.mxu0 %v1394_v20 }
  0x46   : > { %1315 = vmatmul.mubr.bf16.gmra.mrb[8].mxu0 %v1395_v21 }
  0x47   : > { %1318 = vmatprep.mubr.bf16.mxu0 %v1396_v22 }
  0x4e   : > { %1319 = vmatmul.mubr.bf16.gmra.mrb[12].mxu0 %v1397_v23 }
 0x109   : > { %v1308_v32 = vpop.f32.mrb[0].mxu0 }
 0x10a   : > { %v387_v35 = vpop.f32.mrb[1].mxu0 }
 0x10b   : > { %v476_v36 = vadd.f32 %v474_v30, %v387_v35  ;;  %v1309_v37 = vpop.f32.mrb[2].mxu0 }
 0x10c   : > { %v390_v39 = vpop.f32.mrb[3].mxu0 }
 0x10d   : > { %v480_v40 = vadd.f32 %v478_v33, %v476_v36  ;;  %v494_v41 = vmul.f32 0.75, %v476_v36  ;;  %v477_v42 = vadd.f32 %v475_v34, %v390_v39 }
 0x10f   : > { %vm482_vm0 = vcmp.ge.f32.partialorder %v480_v40, 5120.0  ;;  %v481_v43 = vadd.f32 %v479_v38, %v477_v42  ;;  %v495_v44 = vmul.f32 0.75, %v477_v42  ;;  %v496_v45 = vadd.f32 %v1308_v32, %v494_v41 }
 0x110   : > { %v489_v46 = vsel %vm482_vm0, 0.0, %v480_v40 }
 0x111   : > { %v498_v47 = vmul.f32 0.96875, %v489_v46  ;;  %vm483_vm1 = vcmp.ge.f32.partialorder %v481_v43, 5120.0  ;;  %v1312_v48 = vpop.f32.mrb[4].mxu0  ;;  %v514_v49 = vmul.f32 0.75, %v496_v45  ;;  %v497_v50 = vadd.f32 %v1309_v37, %v495_v44 }
 0x112   : > { %v490_v51 = vsel %vm483_vm1, 0.0, %v481_v43  ;;  %v403_v52 = vpop.f32.mrb[5].mxu0  ;;  %vm1244_vm2 = vmpackc.low %vm483_vm1, %vm482_vm0 }
 0x113   : > { %v499_v53 = vmul.f32 0.96875, %v490_v51  ;;  %v500_v54 = vadd.f32 %v498_v47, %v496_v45  ;;  %v516_v55 = vadd.f32 %v514_v49, %v403_v52  ;;  %v1313_v56 = vpop.f32.mrb[6].mxu0  ;;  %1339 = vmatmul.mubr.msk.bf16.vlgmr.msra.gmra.mrb[0].mxu1 %vm1244_vm2, %v1434_v57  ;;  %v515_v58 = vmul.f32 0.75, %v497_v50 }
 0x114   : > { %v406_v59 = vpop.f32.mrb[7].mxu0 }
 0x115   : > { %vm502_vm3 = vcmp.ge.f32.partialorder %v500_v54, 5120.0  ;;  %v534_v60 = vmul.f32 0.75, %v516_v55  ;;  %v501_v61 = vadd.f32 %v499_v53, %v497_v50  ;;  %v517_v62 = vadd.f32 %v515_v58, %v406_v59 }
 0x116   : > { %v509_v63 = vsel %vm502_vm3, 0.0, %v500_v54 }
 0x117   : > { %v518_v0 = vmul.f32 0.96875, %v509_v63  ;;  %vm503_vm4 = vcmp.ge.f32.partialorder %v501_v61, 5120.0  ;;  %v535_v1 = vmul.f32 0.75, %v517_v62  ;;  %v536_v2 = vadd.f32 %v1312_v48, %v534_v60 }
 0x118   : > { %v510_v3 = vsel %vm503_vm4, 0.0, %v501_v61  ;;  %vm1246_vm5 = vmpackc.low %vm503_vm4, %vm502_vm3 }
 0x119   : > { %v520_v4 = vadd.f32 %v518_v0, %v516_v55  ;;  %v519_v5 = vmul.f32 0.96875, %v510_v3  ;;  %v1316_v6 = vpop.f32.mrb[8].mxu0  ;;  %1342 = vmatprep.mubr.msk.bf16.mxu1 %vm1246_vm5, %v1434_v57  ;;  %v554_v7 = vmul.f32 0.75, %v536_v2  ;;  %v537_v8 = vadd.f32 %v1313_v56, %v535_v1 }
 0x11a   : > { %v419_v9 = vpop.f32.mrb[9].mxu0  ;;  %v1435_v0 = vmov 0.0  }
 0x11b   : > { %vm522_vm6 = vcmp.ge.f32.partialorder %v520_v4, 5120.0  ;;  %v521_v10 = vadd.f32 %v519_v5, %v517_v62  ;;  %v556_v11 = vadd.f32 %v554_v7, %v419_v9  ;;  %v1317_v12 = vpop.f32.mrb[10].mxu0  ;;  %v555_v13 = vmul.f32 0.75, %v537_v8  ;;  %v818_v5 = vld [vmem:[#allocation10] sm:$0xff] }
 0x11c   : > { %v529_v14 = vsel %vm522_vm6, 0.0, %v520_v4  ;;  %v422_v15 = vpop.f32.mrb[11].mxu0  ;;  %v1171_v7 = vcombine.high %v818_v5, %v818_v5  ;;  %v829_v9 = vld [vmem:[#allocation7 + $0x8] sm:$0xff] }
 0x11d   : > { %v538_v16 = vmul.f32 0.96875, %v529_v14  ;;  %vm523_vm7 = vcmp.ge.f32.partialorder %v521_v10, 5120.0  ;;  %v574_v17 = vmul.f32 0.75, %v556_v11  ;;  %v557_v18 = vadd.f32 %v555_v13, %v422_v15 }
 0x11e   : > { %v530_v19 = vsel %vm523_vm7, 0.0, %v521_v10  ;;  %vm1248_vm8 = vmpackc.low %vm523_vm7, %vm522_vm6  ;;  %827 = vst [vmem:[%s1482_s23 + $0x4] sm:$0xf] %v1171_v7  ;;  %v835_v14 = vmul.f32 0.75, %v829_v9 }
 0x11f   : > { %v539_v20 = vmul.f32 0.96875, %v530_v19  ;;  %v540_v21 = vadd.f32 %v538_v16, %v536_v2  ;;  %v575_v22 = vmul.f32 0.75, %v557_v18  ;;  %1343 = vmatmul.mubr.msk.bf16.gmra.mrb[4].mxu1 %vm1248_vm8, %v1434_v57  ;;  %v576_v23 = vadd.f32 %v1316_v6, %v574_v17 }
 0x120   : > { %v1170_v6 = vcombine.low %v818_v5, %v818_v5 }
 0x121   : > { %vm542_vm9 = vcmp.ge.f32.partialorder %v540_v21, 5120.0  ;;  %v541_v24 = vadd.f32 %v539_v20, %v537_v8  ;;  %v1320_v25 = vpop.f32.mrb[12].mxu0  ;;  %v594_v26 = vmul.f32 0.75, %v576_v23  ;;  %v577_v27 = vadd.f32 %v1317_v12, %v575_v22  ;;  %v830_v8 = vld [vmem:[#allocation8] sm:$0xff] }
 0x122   : > { %v549_v28 = vsel %vm542_vm9, 0.0, %v540_v21  ;;  %v435_v29 = vpop.f32.mrb[13].mxu0  ;;  %826 = vst [vmem:[%s1482_s23] sm:$0xf] %v1170_v6  ;;  %v838_v13 = vmul.f32 0.96875, %v830_v8 }
 0x123   : > { %v558_v30 = vmul.f32 0.96875, %v549_v28  ;;  %vm543_vm10 = vcmp.ge.f32.partialorder %v541_v24, 5120.0  ;;  %v596_v31 = vadd.f32 %v594_v26, %v435_v29  ;;  %v1321_v32 = vpop.f32.mrb[14].mxu0  ;;  %v595_v33 = vmul.f32 0.75, %v577_v27 }
 0x124   : > { %v550_v34 = vsel %vm543_vm10, 0.0, %v541_v24  ;;  %v438_v35 = vpop.f32.mrb[15].mxu0  ;;  %vm1250_vm11 = vmpackc.low %vm543_vm10, %vm542_vm9 }
 0x125   : > { %v560_v36 = vadd.f32 %v558_v30, %v556_v11  ;;  %v559_v37 = vmul.f32 0.96875, %v550_v34  ;;  %v613_v38 = vmul.f32 0.75, %v596_v31  ;;  %v597_v39 = vadd.f32 %v595_v33, %v438_v35  ;;  %1346 = vmatprep.mubr.msk.bf16.mxu1 %vm1250_vm11, %v1434_v57  ;;  %v831_v11 = vld [vmem:[#allocation8 + $0x8] sm:$0xff] }
 0x127   : > { %vm562_vm12 = vcmp.ge.f32.partialorder %v560_v36, 5120.0  ;;  %v561_v40 = vadd.f32 %v559_v37, %v557_v18  ;;  %v615_v41 = vadd.f32 %v1320_v25, %v613_v38  ;;  %v614_v42 = vmul.f32 0.75, %v597_v39 }
 0x128   : > { %v569_v43 = vsel %vm562_vm12, 0.0, %v560_v36  ;;  %v839_v18 = vmul.f32 0.96875, %v831_v11 }
 0x129   : > { %v578_v44 = vmul.f32 0.96875, %v569_v43  ;;  %vm563_vm13 = vcmp.ge.f32.partialorder %v561_v40, 5120.0  ;;  %627 = vst [vmem:[#allocation5] sm:$0xff] %v615_v41  ;;  %v616_v45 = vadd.f32 %v1321_v32, %v614_v42 }
 0x12a   : > { %v570_v46 = vsel %vm563_vm13, 0.0, %v561_v40  ;;  %vm1252_vm14 = vmpackc.low %vm563_vm13, %vm562_vm12 }
 0x12b   : > { %v579_v47 = vmul.f32 0.96875, %v570_v46  ;;  %v580_v48 = vadd.f32 %v578_v44, %v576_v23  ;;  %628 = vst [vmem:[#allocation5 + $0x8] sm:$0xff] %v616_v45  ;;  %1347 = vmatmul.mubr.msk.bf16.gmra.mrb[8].mxu1 %vm1252_vm14, %v1434_v57 }
 0x12d   : > { %vm582_vm15 = vcmp.ge.f32.partialorder %v580_v48, 5120.0  ;;  %v581_v49 = vadd.f32 %v579_v47, %v577_v27 }
 0x12e   : > { %v589_v50 = vsel %vm582_vm15, 0.0, %v580_v48 }
 0x12f   : > { %v598_v51 = vmul.f32 0.96875, %v589_v50  ;;  %vm583_vm0 = vcmp.ge.f32.partialorder %v581_v49, 5120.0 }
 0x130   : > { %v590_v52 = vsel %vm583_vm0, 0.0, %v581_v49  ;;  %vm1254_vm1 = vmpackc.low %vm583_vm0, %vm582_vm15 }
 0x131   : > { %v600_v53 = vadd.f32 %v598_v51, %v596_v31  ;;  %v599_v54 = vmul.f32 0.96875, %v590_v52  ;;  %1350 = vmatprep.mubr.msk.bf16.mxu1 %vm1254_vm1, %v1434_v57 }
 0x133   : > { %vm602_vm2 = vcmp.ge.f32.partialorder %v600_v53, 5120.0  ;;  %v601_v55 = vadd.f32 %v599_v54, %v597_v39 }
 0x134   : > { %v609_v56 = vsel %vm602_vm2, 0.0, %v600_v53 }
 0x135   : > { %v617_v58 = vmul.f32 0.96875, %v609_v56  ;;  %vm603_vm3 = vcmp.ge.f32.partialorder %v601_v55, 5120.0 }
 0x136   : > { %v610_v59 = vsel %vm603_vm3, 0.0, %v601_v55  ;;  %vm1256_vm4 = vmpackc.low %vm603_vm3, %vm602_vm2 }
 0x137   : > { %v619_v60 = vadd.f32 %v617_v58, %v615_v41  ;;  %v618_v61 = vmul.f32 0.96875, %v610_v59  ;;  %1351 = vmatmul.mubr.msk.bf16.gmra.mrb[12].mxu1 %vm1256_vm4, %v1434_v57  ;;  %v828_v57 = vld [vmem:[#allocation7] sm:$0xff] }
 0x138   : > { %v834_v10 = vmul.f32 0.75, %v828_v57 }
 0x139   : > { %vm621_vm5 = vcmp.ge.f32.partialorder %v619_v60, 5120.0  ;;  %v620_v62 = vadd.f32 %v618_v61, %v616_v45 }
 0x13a   : > { %v629_v63 = vsel %vm621_vm5, 0.0, %v619_v60  ;;  %v623_v1 = vsel %vm621_vm5, 1.0, %v1435_v0 }
 0x13b   : > { %631 = vst [vmem:[#allocation6] sm:$0xff] %v629_v63  ;;  %vm622_vm6 = vcmp.ge.f32.partialorder %v620_v62, 5120.0 }
 0x13c   : > { %v624_v2 = vsel %vm622_vm6, 1.0, %v1435_v0  ;;  %v630_v3 = vsel %vm622_vm6, 0.0, %v620_v62 }
 0x13d   : > { %v625_v4 = vpack.c.bf16 %v624_v2, %v623_v1  ;;  %632 = vst [vmem:[#allocation6 + $0x8] sm:$0xff] %v630_v3 }
 0x13f   : > { %626 = vst [vmem:[#allocation9] sm:$0xff] %v625_v4 }
 0x1e6   : > { %v1340_v12 = vpop.f32.mrb[0].mxu1 }
 0x1e7   : > { %v739_v15 = vpop.f32.mrb[1].mxu1 }
 0x1e8   : > { %v836_v16 = vadd.f32 %v834_v10, %v739_v15  ;;  %v1341_v17 = vpop.f32.mrb[2].mxu1 }
 0x1e9   : > { %v742_v19 = vpop.f32.mrb[3].mxu1 }
 0x1ea   : > { %v840_v20 = vadd.f32 %v838_v13, %v836_v16  ;;  %v862_v21 = vmul.f32 0.75, %v836_v16  ;;  %v837_v22 = vadd.f32 %v835_v14, %v742_v19 }
 0x1ec   : > { %vm842_vm7 = vcmp.ge.f32.partialorder %v840_v20, 5120.0  ;;  %v841_v23 = vadd.f32 %v839_v18, %v837_v22  ;;  %v863_v24 = vmul.f32 0.75, %v837_v22  ;;  %v864_v25 = vadd.f32 %v1340_v12, %v862_v21 }
 0x1ed   : > { %v857_v26 = vsel %vm842_vm7, 0.0, %v840_v20  ;;  %v844_v29 = vsel %vm842_vm7, 1.0, %v1435_v0 }
 0x1ee   : > { %v866_v27 = vmul.f32 0.96875, %v857_v26  ;;  %vm843_vm8 = vcmp.ge.f32.partialorder %v841_v23, 5120.0  ;;  %v865_v28 = vadd.f32 %v1341_v17, %v863_v24  ;;  %v890_v36 = vmul.f32 0.75, %v864_v25 }
 0x1ef   : > { %v845_v30 = vsel %vm843_vm8, 1.0, %v1435_v0  ;;  %v858_v31 = vsel %vm843_vm8, 0.0, %v841_v23 }
 0x1f0   : > { %v1217_v32 = vpack.c.bf16 %v845_v30, %v844_v29  ;;  %v867_v33 = vmul.f32 0.96875, %v858_v31  ;;  %v868_v34 = vadd.f32 %v866_v27, %v864_v25  ;;  %v891_v43 = vmul.f32 0.75, %v865_v28 }
 0x1f2   : > { %1237 = vst [vmem:[%s1482_s23 + $0x8] sm:$0xff] %v1217_v32   ;;  %v1344_v35 = vpop.f32.mrb[4].mxu1  ;;  %vm870_vm9 = vcmp.ge.f32.partialorder %v868_v34, 5120.0  ;;  %v869_v37 = vadd.f32 %v867_v33, %v865_v28 }
 0x1f3   : > { %v755_v38 = vpop.f32.mrb[5].mxu1  ;;  %v885_v39 = vsel %vm870_vm9, 0.0, %v868_v34  ;;  %v872_v44 = vsel %vm870_vm9, 1.0, %v1435_v0 }
 0x1f4   : > { %v892_v40 = vadd.f32 %v890_v36, %v755_v38  ;;  %v894_v41 = vmul.f32 0.96875, %v885_v39  ;;  %v1345_v42 = vpop.f32.mrb[6].mxu1  ;;  %vm871_vm10 = vcmp.ge.f32.partialorder %v869_v37, 5120.0 }
 0x1f5   : > { %v758_v45 = vpop.f32.mrb[7].mxu1  ;;  %v873_v46 = vsel %vm871_vm10, 1.0, %v1435_v0  ;;  %v886_v47 = vsel %vm871_vm10, 0.0, %v869_v37 }
 0x1f6   : > { %v896_v48 = vadd.f32 %v894_v41, %v892_v40  ;;  %v918_v49 = vmul.f32 0.75, %v892_v40  ;;  %v1220_v50 = vpack.c.bf16 %v873_v46, %v872_v44  ;;  %v893_v51 = vadd.f32 %v891_v43, %v758_v45 }
 0x1f7   : > { %v895_v52 = vmul.f32 0.96875, %v886_v47 }
 0x1f8   : > { %vm898_vm11 = vcmp.ge.f32.partialorder %v896_v48, 5120.0  ;;  %1238 = vst [vmem:[%s1482_s23 + $0x10] sm:$0xff] %v1220_v50   ;;  %v919_v53 = vmul.f32 0.75, %v893_v51  ;;  %v920_v54 = vadd.f32 %v1344_v35, %v918_v49 }
 0x1f9   : > { %v913_v55 = vsel %vm898_vm11, 0.0, %v896_v48  ;;  %v897_v56 = vadd.f32 %v895_v52, %v893_v51  ;;  %v900_v60 = vsel %vm898_vm11, 1.0, %v1435_v0 }
 0x1fa   : > { %v922_v58 = vmul.f32 0.96875, %v913_v55  ;;  %v921_v59 = vadd.f32 %v1345_v42, %v919_v53  ;;  %v946_v4 = vmul.f32 0.75, %v920_v54 }
 0x1fb   : > { %vm899_vm12 = vcmp.ge.f32.partialorder %v897_v56, 5120.0 }
 0x1fc   : > { %v901_v61 = vsel %vm899_vm12, 1.0, %v1435_v0  ;;  %v914_v62 = vsel %vm899_vm12, 0.0, %v897_v56  ;;  %v924_v63 = vadd.f32 %v922_v58, %v920_v54  ;;  %v947_v12 = vmul.f32 0.75, %v921_v59 }
 0x1fd   : > { %v1223_v1 = vpack.c.bf16 %v901_v61, %v900_v60  ;;  %v923_v2 = vmul.f32 0.96875, %v914_v62 }
 0x1fe   : > { %v1348_v3 = vpop.f32.mrb[8].mxu1  ;;  %vm926_vm13 = vcmp.ge.f32.partialorder %v924_v63, 5120.0 }
 0x1ff   : > { %1239 = vst [vmem:[%s1482_s23 + $0x18] sm:$0xff] %v1223_v1   ;;  %v771_v5 = vpop.f32.mrb[9].mxu1  ;;  %v941_v6 = vsel %vm926_vm13, 0.0, %v924_v63  ;;  %v925_v7 = vadd.f32 %v923_v2, %v921_v59  ;;  %v928_v10 = vsel %vm926_vm13, 1.0, %v1435_v0 }
 0x200   : > { %v948_v57 = vadd.f32 %v946_v4, %v771_v5  ;;  %v950_v8 = vmul.f32 0.96875, %v941_v6  ;;  %v1349_v9 = vpop.f32.mrb[10].mxu1 }
 0x201   : > { %v774_v11 = vpop.f32.mrb[11].mxu1  ;;  %vm927_vm14 = vcmp.ge.f32.partialorder %v925_v7, 5120.0 }
 0x202   : > { %v952_v13 = vadd.f32 %v950_v8, %v948_v57  ;;  %v974_v14 = vmul.f32 0.75, %v948_v57  ;;  %v929_v15 = vsel %vm927_vm14, 1.0, %v1435_v0  ;;  %v942_v16 = vsel %vm927_vm14, 0.0, %v925_v7 }
 0x203   : > { %v1226_v17 = vpack.c.bf16 %v929_v15, %v928_v10  ;;  %v949_v18 = vadd.f32 %v947_v12, %v774_v11  ;;  %v951_v19 = vmul.f32 0.96875, %v942_v16 }
 0x204   : > { %vm954_vm15 = vcmp.ge.f32.partialorder %v952_v13, 5120.0  ;;  %v976_v20 = vadd.f32 %v1348_v3, %v974_v14 }
 0x205   : > { %v969_v21 = vsel %vm954_vm15, 0.0, %v952_v13  ;;  %1240 = vst [vmem:[%s1482_s23 + $0x20] sm:$0xff] %v1226_v17   ;;  %v953_v22 = vadd.f32 %v951_v19, %v949_v18  ;;  %v975_v23 = vmul.f32 0.75, %v949_v18  ;;  %v956_v26 = vsel %vm954_vm15, 1.0, %v1435_v0 }
 0x206   : > { %v978_v24 = vmul.f32 0.96875, %v969_v21  ;;  %v1002_v33 = vmul.f32 0.75, %v976_v20 }
 0x207   : > { %vm955_vm0 = vcmp.ge.f32.partialorder %v953_v22, 5120.0  ;;  %v977_v25 = vadd.f32 %v1349_v9, %v975_v23 }
 0x208   : > { %v957_v27 = vsel %vm955_vm0, 1.0, %v1435_v0  ;;  %v970_v28 = vsel %vm955_vm0, 0.0, %v953_v22  ;;  %v980_v29 = vadd.f32 %v978_v24, %v976_v20 }
 0x209   : > { %v1229_v30 = vpack.c.bf16 %v957_v27, %v956_v26  ;;  %v979_v31 = vmul.f32 0.96875, %v970_v28  ;;  %v1003_v42 = vmul.f32 0.75, %v977_v25 }
 0x20a   : > { %v1352_v32 = vpop.f32.mrb[12].mxu1  ;;  %vm982_vm1 = vcmp.ge.f32.partialorder %v980_v29, 5120.0 }
 0x20b   : > { %1241 = vst [vmem:[%s1482_s23 + $0x28] sm:$0xff] %v1229_v30   ;;  %v787_v34 = vpop.f32.mrb[13].mxu1  ;;  %v997_v35 = vsel %vm982_vm1, 0.0, %v980_v29  ;;  %v981_v36 = vadd.f32 %v979_v31, %v977_v25  ;;  %v984_v40 = vsel %vm982_vm1, 1.0, %v1435_v0 }
 0x20c   : > { %v1004_v37 = vadd.f32 %v1002_v33, %v787_v34  ;;  %v1006_v38 = vmul.f32 0.96875, %v997_v35  ;;  %v1353_v39 = vpop.f32.mrb[14].mxu1 }
 0x20d   : > { %v790_v41 = vpop.f32.mrb[15].mxu1  ;;  %vm983_vm2 = vcmp.ge.f32.partialorder %v981_v36, 5120.0 }
 0x20e   : > { %v1008_v43 = vadd.f32 %v1006_v38, %v1004_v37  ;;  %v1029_v44 = vmul.f32 0.75, %v1004_v37  ;;  %v985_v45 = vsel %vm983_vm2, 1.0, %v1435_v0  ;;  %v998_v46 = vsel %vm983_vm2, 0.0, %v981_v36 }
 0x20f   : > { %v1232_v47 = vpack.c.bf16 %v985_v45, %v984_v40  ;;  %v1005_v48 = vadd.f32 %v1003_v42, %v790_v41  ;;  %v1007_v49 = vmul.f32 0.96875, %v998_v46 }
 0x210   : > { %vm1010_vm3 = vcmp.ge.f32.partialorder %v1008_v43, 5120.0  ;;  %v1031_v50 = vadd.f32 %v1352_v32, %v1029_v44 }
 0x211   : > { %v1025_v51 = vsel %vm1010_vm3, 0.0, %v1008_v43  ;;  %1242 = vst [vmem:[%s1482_s23 + $0x30] sm:$0xff] %v1232_v47   ;;  %v1009_v52 = vadd.f32 %v1007_v49, %v1005_v48  ;;  %v1030_v53 = vmul.f32 0.75, %v1005_v48  ;;  %v1012_v56 = vsel %vm1010_vm3, 1.0, %v1435_v0 }
 0x212   : > { %v1033_v54 = vmul.f32 0.96875, %v1025_v51  ;;  %1043 = vst [vmem:[#allocation7] sm:$0xff] %v1031_v50 }
 0x213   : > { %vm1011_vm4 = vcmp.ge.f32.partialorder %v1009_v52, 5120.0  ;;  %v1032_v55 = vadd.f32 %v1353_v39, %v1030_v53 }
 0x214   : > { %v1035_v58 = vadd.f32 %v1033_v54, %v1031_v50  ;;  %v1013_v59 = vsel %vm1011_vm4, 1.0, %v1435_v0  ;;  %v1026_v60 = vsel %vm1011_vm4, 0.0, %v1009_v52 }
 0x215   : > { %v1235_v61 = vpack.c.bf16 %v1013_v59, %v1012_v56  ;;  %v1034_v62 = vmul.f32 0.96875, %v1026_v60  ;;  %1044 = vst [vmem:[#allocation7 + $0x8] sm:$0xff] %v1032_v55 }
 0x216   : > { %vm1037_vm5 = vcmp.ge.f32.partialorder %v1035_v58, 5120.0 }
 0x217   : > { %v1045_v63 = vsel %vm1037_vm5, 0.0, %v1035_v58  ;;  %1243 = vst [vmem:[%s1482_s23 + $0x38] sm:$0xff] %v1235_v61   ;;  %v1036_v1 = vadd.f32 %v1034_v62, %v1032_v55  ;;  %v1039_v2 = vsel %vm1037_vm5, 1.0, %v1435_v0 }
 0x218   : > { %1047 = vst [vmem:[#allocation8] sm:$0xff] %v1045_v63 }
 0x219   : > { %vm1038_vm6 = vcmp.ge.f32.partialorder %v1036_v1, 5120.0 }
 0x21a   : > { %v1040_v3 = vsel %vm1038_vm6, 1.0, %v1435_v0  ;;  %v1046_v4 = vsel %vm1038_vm6, 0.0, %v1036_v1 }
 0x21b   : > { %v1041_v5 = vpack.c.bf16 %v1040_v3, %v1039_v2  ;;  %1048 = vst [vmem:[#allocation8 + $0x8] sm:$0xff] %v1046_v4 }
 0x21d   : > { %1042 = vst [vmem:[#allocation10] sm:$0xff] %v1041_v5 }
 0x21e PF: > { %s13_s14 = sadd.s32 1, %s1430_s14   ;;  %s1587_s12 = smov %s1426_s13 }
 0x21f   : > { %p10_p6 = scmp.ge.s32.totalorder %s13_s14, 6   ;;  %s1588_s13 = smov %s1590_s15 }
 0x221   :  { %12 = sbr.rel (!%p10_p6) target bundleno = 2 (0x2), region = 92 }

</bundles_post_ra>
